<compile_context>
chip_gen: v5e
topology: v5e:2x2
jax: 0.10.0
libtpu: 0.0.40
codegen_flags: <defaults>
</compile_context>

<pallas_src>
import functools

import jax
import jax.numpy as jnp
from jax.experimental import pallas as pl
from jax.experimental.pallas import tpu as pltpu


K_IN = 28 * 28   # 784 logical input features (nn.Flatten of 1x28x28)
K_PAD = 896      # 7 * 128, lane-aligned K for layer 1 (zero-padded)
H = 512          # hidden width
N_OUT = 10       # logical number of classes
N_PAD = 128      # lane-dense padded output width (full vst, no masked stores)


def mlp_kernel(x_ref, w1_ref, b1_ref, w2_ref, b2_ref, w3_ref, b3_ref, o_ref):
    # Layer 1: Linear(896 -> 512) + ReLU. bf16 operands, f32 MXU accumulation.
    h1 = jnp.dot(x_ref[...], w1_ref[...], preferred_element_type=jnp.float32)
    h1 = jnp.maximum(h1 + b1_ref[...], 0.0).astype(jnp.bfloat16)

    # Layer 2: Linear(512 -> 512) + ReLU.
    h2 = jnp.dot(h1, w2_ref[...], preferred_element_type=jnp.float32)
    h2 = jnp.maximum(h2 + b2_ref[...], 0.0).astype(jnp.bfloat16)

    # Layer 3: Linear(512 -> 128-padded) logits; cols 10..127 carry zero weights/bias.
    logits = jnp.dot(h2, w3_ref[...], preferred_element_type=jnp.float32)
    o_ref[...] = (logits + b3_ref[...]).astype(o_ref.dtype)


def _round_up(x, m):
    return (x + m - 1) // m * m


def prepare_params(params):
    """One-time packing at weight-load time: pad to TPU-friendly shapes, cast to bf16.

    Weights are stored (in, out) = torch_weight.T so the kernel computes x @ W + b,
    identical to torch's x @ weight.T + bias. Padding is zeros (exact semantics).
    Biases stay f32 (bias-add / ReLU done in f32 inside the kernel).
    """
    w1 = jnp.pad(params["w1"], ((0, K_PAD - K_IN), (0, 0))).astype(jnp.bfloat16)
    w2 = params["w2"].astype(jnp.bfloat16)
    w3 = jnp.pad(params["w3"], ((0, 0), (0, N_PAD - N_OUT))).astype(jnp.bfloat16)
    b1 = params["b1"].astype(jnp.float32)
    b2 = params["b2"].astype(jnp.float32)
    b3 = jnp.pad(params["b3"], ((0, 0), (0, N_PAD - N_OUT))).astype(jnp.float32)
    return dict(w1=w1, b1=b1, w2=w2, b2=b2, w3=w3, b3=b3)


@functools.partial(jax.jit, static_argnames=("tb",))
def neural_network_forward(x_nchw, packed, *, tb=256):
    """Forward pass matching the PyTorch NeuralNetwork module.

    x_nchw: (B, 1, 28, 28) float32 (NCHW, like the torch module expects)
    packed: output of prepare_params()
    returns logits of shape (B, 10) float32.
    """
    B = x_nchw.shape[0]

    # nn.Flatten(): (B, 1, 28, 28) -> (B, 784); pad K to 896 with zeros.
    x = x_nchw.reshape(B, K_IN).astype(jnp.float32)
    x = jnp.pad(x, ((0, 0), (0, K_PAD - K_IN)))

    # Batch tile: multiple of 8 sublanes, capped at `tb` (256 matches the v6e/v7x
    # 256-wide MXU when compute-bound; tiny batches get a single minimal tile).
    tb_eff = min(tb, _round_up(B, 8))
    bp = _round_up(B, tb_eff)
    if bp != B:
        x = jnp.pad(x, ((0, bp - B), (0, 0)))
    x = x.astype(jnp.bfloat16)

    grid = (bp // tb_eff,)

    out = pl.pallas_call(
        mlp_kernel,
        out_shape=jax.ShapeDtypeStruct((bp, N_PAD), jnp.float32),
        grid=grid,
        in_specs=[
            # x tile marches over the batch; auto double-buffered by Pallas.
            pl.BlockSpec((tb_eff, K_PAD), lambda i: (i, 0)),
            # Weights / biases: constant block index -> stay resident in VMEM.
            pl.BlockSpec((K_PAD, H), lambda i: (0, 0)),
            pl.BlockSpec((1, H), lambda i: (0, 0)),
            pl.BlockSpec((H, H), lambda i: (0, 0)),
            pl.BlockSpec((1, H), lambda i: (0, 0)),
            pl.BlockSpec((H, N_PAD), lambda i: (0, 0)),
            pl.BlockSpec((1, N_PAD), lambda i: (0, 0)),
        ],
        out_specs=pl.BlockSpec((tb_eff, N_PAD), lambda i: (i, 0)),
        compiler_params=pltpu.CompilerParams(
            dimension_semantics=("parallel",),
        ),
    )(x, packed["w1"], packed["b1"], packed["w2"], packed["b2"],
      packed["w3"], packed["b3"])

    # Strip batch / lane padding: exact logical logits.
    return out[:B, :N_OUT]


def init_params(key):
    """Deterministic parameter init matching the module's shapes.

    Mimics PyTorch nn.Linear's U(-1/sqrt(fan_in), 1/sqrt(fan_in)) init (synthetic,
    not a checkpoint load). Weights stored as (in, out) = torch_weight.T.
    """
    dims = [(K_IN, H), (H, H), (H, N_OUT)]
    params = {}
    for i, (fan_in, fan_out) in enumerate(dims, start=1):
        key, kw, kb = jax.random.split(key, 3)
        bound = 1.0 / jnp.sqrt(jnp.float32(fan_in))
        params[f"w{i}"] = jax.random.uniform(
            kw, (fan_in, fan_out), jnp.float32, minval=-bound, maxval=bound
        )
        params[f"b{i}"] = jax.random.uniform(
            kb, (1, fan_out), jnp.float32, minval=-bound, maxval=bound
        )
    return params


if __name__ == "__main__":
    key = jax.random.PRNGKey(0)
    kx, kp = jax.random.split(key)

    # Small batch of MNIST-shaped inputs (NCHW, like the torch module).
    B = 8
    x = jax.random.normal(kx, (B, 1, 28, 28), jnp.float32)

    params = init_params(kp)
    packed = prepare_params(params)

    logits = neural_network_forward(x, packed)
    jax.block_until_ready(logits)
    assert logits.shape == (B, N_OUT)

    # Reference 1: pure-JAX forward with the same bf16-operand / f32-accumulate
    # recipe the kernel uses (tight check on kernel plumbing).
    x_flat = x.reshape(B, K_IN)
    w1, b1 = params["w1"], params["b1"]
    w2, b2 = params["w2"], params["b2"]
    w3, b3 = params["w3"], params["b3"]
    xb = x_flat.astype(jnp.bfloat16)
    r1 = jnp.maximum(
        jnp.dot(xb, w1.astype(jnp.bfloat16), preferred_element_type=jnp.float32) + b1,
        0.0,
    ).astype(jnp.bfloat16)
    r2 = jnp.maximum(
        jnp.dot(r1, w2.astype(jnp.bfloat16), preferred_element_type=jnp.float32) + b2,
        0.0,
    ).astype(jnp.bfloat16)
    ref_bf16 = jnp.dot(r2, w3.astype(jnp.bfloat16), preferred_element_type=jnp.float32) + b3
    assert jnp.allclose(logits, ref_bf16, atol=1e-2, rtol=1e-2)

    # Reference 2: full-f32 forward (module semantics); loose tolerance for bf16.
    h1 = jnp.maximum(x_flat @ w1 + b1, 0.0)
    h2 = jnp.maximum(h1 @ w2 + b2, 0.0)
    ref_f32 = h2 @ w3 + b3
    assert jnp.allclose(logits, ref_f32, atol=5e-2, rtol=5e-2)

    print("KERNEL_OK")
</pallas_src>

<mosaic_0001>
module attributes {stable_mosaic.version = 11 : i64} {
  func.func @mlp_kernel(%arg0: i32, %arg1: memref<8x896xbf16, #tpu.memory_space<vmem>>, %arg2: memref<896x512xbf16, #tpu.memory_space<vmem>>, %arg3: memref<1x512xf32, #tpu.memory_space<vmem>>, %arg4: memref<512x512xbf16, #tpu.memory_space<vmem>>, %arg5: memref<1x512xf32, #tpu.memory_space<vmem>>, %arg6: memref<512x128xbf16, #tpu.memory_space<vmem>>, %arg7: memref<1x128xf32, #tpu.memory_space<vmem>>, %arg8: memref<8x128xf32, #tpu.memory_space<vmem>>) attributes {dimension_semantics = [#tpu.dimension_semantics<parallel>], iteration_bounds = array<i64: 1>, scalar_prefetch = 0 : i64, scratch_operands = 0 : i64, tpu.core_type = #tpu.core_type<tc>, window_params = [{transform_indices = @transform_0, window_bounds = array<i64: 8, 896>}, {pipeline_mode = #tpu.pipeline_mode<synchronous>, transform_indices = @transform_1, window_bounds = array<i64: 896, 512>}, {pipeline_mode = #tpu.pipeline_mode<synchronous>, transform_indices = @transform_2, window_bounds = array<i64: 1, 512>}, {pipeline_mode = #tpu.pipeline_mode<synchronous>, transform_indices = @transform_3, window_bounds = array<i64: 512, 512>}, {pipeline_mode = #tpu.pipeline_mode<synchronous>, transform_indices = @transform_4, window_bounds = array<i64: 1, 512>}, {pipeline_mode = #tpu.pipeline_mode<synchronous>, transform_indices = @transform_5, window_bounds = array<i64: 512, 128>}, {pipeline_mode = #tpu.pipeline_mode<synchronous>, transform_indices = @transform_6, window_bounds = array<i64: 1, 128>}, {transform_indices = @transform_7, window_bounds = array<i64: 8, 128>}]} {
    %c0 = arith.constant 0 : index
    %c0_0 = arith.constant 0 : index
    %0 = vector.load %arg1[%c0, %c0_0] : memref<8x896xbf16, #tpu.memory_space<vmem>>, vector<8x896xbf16>
    %c0_1 = arith.constant 0 : index
    %c0_2 = arith.constant 0 : index
    %1 = vector.load %arg2[%c0_1, %c0_2] : memref<896x512xbf16, #tpu.memory_space<vmem>>, vector<896x512xbf16>
    %cst = arith.constant dense<0.000000e+00> : vector<8x512xf32>
    %2 = tpu.matmul %0, %1, %cst {dimension_numbers = #tpu.dot_dimension_numbers<[1], [0], [0], [1], [0, 0, 1, 1], [], []>} : vector<8x896xbf16>, vector<896x512xbf16>, vector<8x512xf32> -> vector<8x512xf32>
    %c0_3 = arith.constant 0 : index
    %c0_4 = arith.constant 0 : index
    %3 = vector.load %arg3[%c0_3, %c0_4] : memref<1x512xf32, #tpu.memory_space<vmem>>, vector<1x512xf32>
    %4 = vector.broadcast %3 : vector<1x512xf32> to vector<8x512xf32>
    %5 = arith.addf %2, %4 : vector<8x512xf32>
    %cst_5 = arith.constant 0.000000e+00 : f32
    %6 = vector.broadcast %cst_5 : f32 to vector<8x512xf32>
    %7 = arith.maximumf %5, %6 : vector<8x512xf32>
    %8 = arith.truncf %7 : vector<8x512xf32> to vector<8x512xbf16>
    %c0_6 = arith.constant 0 : index
    %c0_7 = arith.constant 0 : index
    %9 = vector.load %arg4[%c0_6, %c0_7] : memref<512x512xbf16, #tpu.memory_space<vmem>>, vector<512x512xbf16>
    %cst_8 = arith.constant dense<0.000000e+00> : vector<8x512xf32>
    %10 = tpu.matmul %8, %9, %cst_8 {dimension_numbers = #tpu.dot_dimension_numbers<[1], [0], [0], [1], [0, 0, 1, 1], [], []>} : vector<8x512xbf16>, vector<512x512xbf16>, vector<8x512xf32> -> vector<8x512xf32>
    %c0_9 = arith.constant 0 : index
    %c0_10 = arith.constant 0 : index
    %11 = vector.load %arg5[%c0_9, %c0_10] : memref<1x512xf32, #tpu.memory_space<vmem>>, vector<1x512xf32>
    %12 = vector.broadcast %11 : vector<1x512xf32> to vector<8x512xf32>
    %13 = arith.addf %10, %12 : vector<8x512xf32>
    %cst_11 = arith.constant 0.000000e+00 : f32
    %14 = vector.broadcast %cst_11 : f32 to vector<8x512xf32>
    %15 = arith.maximumf %13, %14 : vector<8x512xf32>
    %16 = arith.truncf %15 : vector<8x512xf32> to vector<8x512xbf16>
    %c0_12 = arith.constant 0 : index
    %c0_13 = arith.constant 0 : index
    %17 = vector.load %arg6[%c0_12, %c0_13] : memref<512x128xbf16, #tpu.memory_space<vmem>>, vector<512x128xbf16>
    %cst_14 = arith.constant dense<0.000000e+00> : vector<8x128xf32>
    %18 = tpu.matmul %16, %17, %cst_14 {dimension_numbers = #tpu.dot_dimension_numbers<[1], [0], [0], [1], [0, 0, 1, 1], [], []>} : vector<8x512xbf16>, vector<512x128xbf16>, vector<8x128xf32> -> vector<8x128xf32>
    %c0_15 = arith.constant 0 : index
    %c0_16 = arith.constant 0 : index
    %19 = vector.load %arg7[%c0_15, %c0_16] : memref<1x128xf32, #tpu.memory_space<vmem>>, vector<1x128xf32>
    %20 = vector.broadcast %19 : vector<1x128xf32> to vector<8x128xf32>
    %21 = arith.addf %18, %20 : vector<8x128xf32>
    %c0_17 = arith.constant 0 : index
    %c0_18 = arith.constant 0 : index
    %22 = vector.load %arg8[%c0_17, %c0_18] : memref<8x128xf32, #tpu.memory_space<vmem>>, vector<8x128xf32>
    tpu.vector_store %arg8[%c0_17, %c0_18], %21 {strides = array<i32>} : memref<8x128xf32, #tpu.memory_space<vmem>>, vector<8x128xf32>,
    return
  }
  func.func @transform_0(%arg0: i32) -> (i32, i32) {
    %c0_i32 = arith.constant 0 : i32
    %c0_i32_0 = arith.constant 0 : i32
    return %arg0, %c0_i32 : i32, i32
  }
  func.func @transform_1(%arg0: i32) -> (i32, i32) {
    %c0_i32 = arith.constant 0 : i32
    %c0_i32_0 = arith.constant 0 : i32
    %c0_i32_1 = arith.constant 0 : i32
    return %c0_i32, %c0_i32_0 : i32, i32
  }
  func.func @transform_2(%arg0: i32) -> (i32, i32) {
    %c0_i32 = arith.constant 0 : i32
    %c0_i32_0 = arith.constant 0 : i32
    %c0_i32_1 = arith.constant 0 : i32
    return %c0_i32, %c0_i32_0 : i32, i32
  }
  func.func @transform_3(%arg0: i32) -> (i32, i32) {
    %c0_i32 = arith.constant 0 : i32
    %c0_i32_0 = arith.constant 0 : i32
    %c0_i32_1 = arith.constant 0 : i32
    return %c0_i32, %c0_i32_0 : i32, i32
  }
  func.func @transform_4(%arg0: i32) -> (i32, i32) {
    %c0_i32 = arith.constant 0 : i32
    %c0_i32_0 = arith.constant 0 : i32
    %c0_i32_1 = arith.constant 0 : i32
    return %c0_i32, %c0_i32_0 : i32, i32
  }
  func.func @transform_5(%arg0: i32) -> (i32, i32) {
    %c0_i32 = arith.constant 0 : i32
    %c0_i32_0 = arith.constant 0 : i32
    %c0_i32_1 = arith.constant 0 : i32
    return %c0_i32, %c0_i32_0 : i32, i32
  }
  func.func @transform_6(%arg0: i32) -> (i32, i32) {
    %c0_i32 = arith.constant 0 : i32
    %c0_i32_0 = arith.constant 0 : i32
    %c0_i32_1 = arith.constant 0 : i32
    return %c0_i32, %c0_i32_0 : i32, i32
  }
  func.func @transform_7(%arg0: i32) -> (i32, i32) {
    %c0_i32 = arith.constant 0 : i32
    %c0_i32_0 = arith.constant 0 : i32
    return %arg0, %c0_i32 : i32, i32
  }
}

</mosaic_0001>

<bundles_post_ra>
// kernel: neural_network_forward.1
= control target key start
LH: loop header
LB: loop body
LE: loop exit
PB: predicated region body
PF: predicated region fallthrough
CT: control target
= control target key end

     0   :  { %12 = vsyncpa [#allocation3], 0  ;;  %s5461_s0 = inlined_call_operand.vmem [shape: bf16[8,896], index: 0, kind: input, shape index: {}]   ;;  %s5462_s1 = inlined_call_operand.hbm [shape: bf16[896,512], index: 1, kind: input, shape index: {}]   ;;  %s5463_s2 = inlined_call_operand.vmem [shape: f32[1,512], index: 2, kind: input, shape index: {}]   ;;  %s5464_s3 = inlined_call_operand.hbm [shape: bf16[512,512], index: 3, kind: input, shape index: {}]   ;;  %s5465_s4 = inlined_call_operand.vmem [shape: f32[1,512], index: 4, kind: input, shape index: {}]   ;;  %s5466_s5 = inlined_call_operand.vmem [shape: bf16[512,128], index: 5, kind: input, shape index: {}]   ;;  %s5467_s6 = inlined_call_operand.vmem [shape: f32[1,128], index: 6, kind: input, shape index: {}]   ;;  %s5468_s7 = inlined_call_operand.hbm [shape: f32[8,128], index: 7, kind: output, shape index: {}]  }
   0x1   :  { %13 = vsyncpa [#allocation6], 0 }
   0x2   :  { %14 = vsyncpa [#allocation4], 0  ;;  %s21_s26 = sshll.u32 %s5462_s1, 4  ;;  %s5144_s27 = smov [#allocation2]   ;;  %s22_s26 = int_to_ptr.hbm [resolvable:$true] %s21_s26 }
   0x3   :  { %s23_s28 = sshll.u32 %s5144_s27, 4  ;;  %s36_s8 = sshll.u32 %s5464_s3, 4  ;;  %s24_s28 = int_to_ptr.vmem [resolvable:$true] %s23_s28  ;;  %s37_s8 = int_to_ptr.hbm [resolvable:$true] %s36_s8 }
   0x4   :  { %s5145_s9 = smov 256   ;;  %s5146_s10 = smov 16  }
   0x5   :  { %29 = dma.hbm_to_vmem [thread:$0]  %s22_s26, 28672, %s24_s28, [#allocation3], %s5145_s9, %s5145_s9, %s5146_s10  }
   0x6   :  { %s5147_s11 = smov [#allocation5]  }
   0x7   :  { %s38_s12 = sshll.u32 %s5147_s11, 4  ;;  %s39_s12 = int_to_ptr.vmem [resolvable:$true] %s38_s12 }
   0x8   :  { %44 = dma.hbm_to_vmem [thread:$0]  %s37_s8, 16384, %s39_s12, [#allocation6], %s5145_s9, %s5145_s9, %s5146_s10  }
   0x9   :  { %5138 = dma.done.wait [#allocation3], 28672  }
   0xa   :  { %5139 = vsyncadd [#allocation3], 4294938624 }
   0xb   :  { %5140 = dma.done.wait [#allocation6], 16384  }
   0xc   :  { %5141 = vsyncadd [#allocation6], 4294950912  ;;  %v3253_v0 = vld [vmem:[#allocation2 + $0xe0] sm:$0xf]  ;;  %v4705_v1 = vld [vmem:[#allocation2 + $0xec] sm:$0xf0] }
   0xd   :  { %v3381_v2 = vld [vmem:[#allocation2 + $0x1e0] sm:$0xf]  ;;  %v3254_v3 = vor.u32 %v4705_v1, %v3253_v0  ;;  %v4737_v4 = vld [vmem:[#allocation2 + $0x1ec] sm:$0xf0]  ;;  %s5148_s8 = smov [#allocation7]   ;;  %s3128_s12 = sshll.u32 %s5468_s7, 4  ;;  %s3129_s12 = int_to_ptr.hbm [resolvable:$true] %s3128_s12 }
   0xe   :  { %v3509_v5 = vld [vmem:[#allocation2 + $0x2e0] sm:$0xf]  ;;  %v4769_v6 = vld [vmem:[#allocation2 + $0x2ec] sm:$0xf0]  ;;  %v3382_v7 = vor.u32 %v4737_v4, %v3381_v2  ;;  %s3126_s9 = sshll.u32 %s5148_s8, 4  ;;  %s3127_s9 = int_to_ptr.vmem [resolvable:$true] %s3126_s9 }
   0xf   :  { %v3510_v8 = vor.u32 %v4769_v6, %v3509_v5  ;;  %v3637_v9 = vld [vmem:[#allocation2 + $0x3e0] sm:$0xf]  ;;  %v4801_v10 = vld [vmem:[#allocation2 + $0x3ec] sm:$0xf0]  ;;  %1442 = vmatpush.bf16.msra.mxu0 %v3254_v3 }
  0x10   :  { %v3237_v11 = vld [vmem:[#allocation2 + $0xc0] sm:$0xf]  ;;  %v3638_v12 = vor.u32 %v4801_v10, %v3637_v9  ;;  %v4701_v13 = vld [vmem:[#allocation2 + $0xcc] sm:$0xf0]  ;;  %1455 = vmatpush.bf16.msra.mxu1 %v3382_v7 }
  0x11   :  { %v3365_v14 = vld [vmem:[#allocation2 + $0x1c0] sm:$0xf]  ;;  %v4733_v15 = vld [vmem:[#allocation2 + $0x1cc] sm:$0xf0]  ;;  %1468 = vmatpush.bf16.msra.mxu2 %v3510_v8  ;;  %v3238_v16 = vor.u32 %v4701_v13, %v3237_v11 }
  0x12   :  { %v3366_v17 = vor.u32 %v4733_v15, %v3365_v14  ;;  %v3493_v18 = vld [vmem:[#allocation2 + $0x2c0] sm:$0xf]  ;;  %v4765_v19 = vld [vmem:[#allocation2 + $0x2cc] sm:$0xf0]  ;;  %1481 = vmatpush.bf16.msra.mxu3 %v3638_v12 }
  0x13   :  { %v3621_v20 = vld [vmem:[#allocation2 + $0x3c0] sm:$0xf]  ;;  %v3494_v21 = vor.u32 %v4765_v19, %v3493_v18  ;;  %v4797_v22 = vld [vmem:[#allocation2 + $0x3cc] sm:$0xf0]  ;;  %1443 = vmatpush.bf16.msra.mxu0 %v3238_v16 }
  0x14   :  { %v3221_v23 = vld [vmem:[#allocation2 + $0xa0] sm:$0xf]  ;;  %v4697_v24 = vld [vmem:[#allocation2 + $0xac] sm:$0xf0]  ;;  %v3622_v25 = vor.u32 %v4797_v22, %v3621_v20  ;;  %1456 = vmatpush.bf16.msra.mxu1 %v3366_v17 }
  0x15   :  { %v3349_v26 = vld [vmem:[#allocation2 + $0x1a0] sm:$0xf]  ;;  %v4729_v27 = vld [vmem:[#allocation2 + $0x1ac] sm:$0xf0]  ;;  %v3222_v29 = vor.u32 %v4697_v24, %v3221_v23  ;;  %1469 = vmatpush.bf16.msra.mxu2 %v3494_v21 }
  0x16   :  { %v3477_v28 = vld [vmem:[#allocation2 + $0x2a0] sm:$0xf]  ;;  %v4761_v30 = vld [vmem:[#allocation2 + $0x2ac] sm:$0xf0]  ;;  %v3350_v33 = vor.u32 %v4729_v27, %v3349_v26  ;;  %1482 = vmatpush.bf16.msra.mxu3 %v3622_v25 }
  0x17   :  { %v3605_v31 = vld [vmem:[#allocation2 + $0x3a0] sm:$0xf]  ;;  %v4793_v32 = vld [vmem:[#allocation2 + $0x3ac] sm:$0xf0]  ;;  %v3478_v34 = vor.u32 %v4761_v30, %v3477_v28  ;;  %1444 = vmatpush.bf16.msra.mxu0 %v3222_v29 }
  0x18   :  { %v3205_v35 = vld [vmem:[#allocation2 + $0x80] sm:$0xf]  ;;  %v4693_v36 = vld [vmem:[#allocation2 + $0x8c] sm:$0xf0]  ;;  %v3606_v38 = vor.u32 %v4793_v32, %v3605_v31  ;;  %1457 = vmatpush.bf16.msra.mxu1 %v3350_v33 }
  0x19   :  { %v3333_v37 = vld [vmem:[#allocation2 + $0x180] sm:$0xf]  ;;  %v4725_v39 = vld [vmem:[#allocation2 + $0x18c] sm:$0xf0]  ;;  %v3206_v44 = vor.u32 %v4693_v36, %v3205_v35  ;;  %1470 = vmatpush.bf16.msra.mxu2 %v3478_v34 }
  0x1a   :  { %v3461_v40 = vld [vmem:[#allocation2 + $0x280] sm:$0xf]  ;;  %v4757_v41 = vld [vmem:[#allocation2 + $0x28c] sm:$0xf0]  ;;  %v3334_v45 = vor.u32 %v4725_v39, %v3333_v37  ;;  %1483 = vmatpush.bf16.msra.mxu3 %v3606_v38  ;;  %v4703_v37 = vld [vmem:[#allocation2 + $0xe4] sm:$0xf] }
  0x1b   :  { %v3589_v42 = vld [vmem:[#allocation2 + $0x380] sm:$0xf]  ;;  %v4789_v43 = vld [vmem:[#allocation2 + $0x38c] sm:$0xf0]  ;;  %v3462_v46 = vor.u32 %v4757_v41, %v3461_v40  ;;  %1445 = vmatpush.bf16.msra.mxu0 %v3206_v44  ;;  %v3255_v38 = vld [vmem:[#allocation2 + $0xf0] sm:$0xf0] }
  0x1c   :  { %v3189_v47 = vld [vmem:[#allocation2 + $0x60] sm:$0xf]  ;;  %v4689_v48 = vld [vmem:[#allocation2 + $0x6c] sm:$0xf0]  ;;  %v3590_v50 = vor.u32 %v4789_v43, %v3589_v42  ;;  %1458 = vmatpush.bf16.msra.mxu1 %v3334_v45 }
  0x1d   :  { %v3317_v49 = vld [vmem:[#allocation2 + $0x160] sm:$0xf]  ;;  %v4721_v51 = vld [vmem:[#allocation2 + $0x16c] sm:$0xf0]  ;;  %v3190_v56 = vor.u32 %v4689_v48, %v3189_v47  ;;  %1471 = vmatpush.bf16.msra.mxu2 %v3462_v46  ;;  %v3258_v46 = vor.u32 %v4703_v37, %v3255_v38 }
  0x1e   :  { %v3445_v52 = vld [vmem:[#allocation2 + $0x260] sm:$0xf]  ;;  %v4753_v53 = vld [vmem:[#allocation2 + $0x26c] sm:$0xf0]  ;;  %v3318_v57 = vor.u32 %v4721_v51, %v3317_v49  ;;  %1484 = vmatpush.bf16.msra.mxu3 %v3590_v50  ;;  %v4699_v50 = vld [vmem:[#allocation2 + $0xc4] sm:$0xf] }
  0x1f   :  { %v3573_v54 = vld [vmem:[#allocation2 + $0x360] sm:$0xf]  ;;  %v4785_v55 = vld [vmem:[#allocation2 + $0x36c] sm:$0xf0]  ;;  %v3446_v58 = vor.u32 %v4753_v53, %v3445_v52  ;;  %1446 = vmatpush.bf16.msra.mxu0 %v3190_v56  ;;  %v3239_v51 = vld [vmem:[#allocation2 + $0xd0] sm:$0xf0] }
  0x20   :  { %v3173_v59 = vld [vmem:[#allocation2 + $0x40] sm:$0xf]  ;;  %v4685_v60 = vld [vmem:[#allocation2 + $0x4c] sm:$0xf0]  ;;  %v3574_v62 = vor.u32 %v4785_v55, %v3573_v54  ;;  %1459 = vmatpush.bf16.msra.mxu1 %v3318_v57 }
  0x21   :  { %v3301_v61 = vld [vmem:[#allocation2 + $0x140] sm:$0xf]  ;;  %v4717_v63 = vld [vmem:[#allocation2 + $0x14c] sm:$0xf0]  ;;  %v3174_v4 = vor.u32 %v4685_v60, %v3173_v59  ;;  %1472 = vmatpush.bf16.msra.mxu2 %v3446_v58  ;;  %v3242_v59 = vor.u32 %v4699_v50, %v3239_v51 }
  0x22   :  { %v3429_v0 = vld [vmem:[#allocation2 + $0x240] sm:$0xf]  ;;  %v4749_v1 = vld [vmem:[#allocation2 + $0x24c] sm:$0xf0]  ;;  %v3302_v5 = vor.u32 %v4717_v63, %v3301_v61  ;;  %1485 = vmatpush.bf16.msra.mxu3 %v3574_v62  ;;  %v4695_v62 = vld [vmem:[#allocation2 + $0xa4] sm:$0xf] }
  0x23   :  { %v3557_v2 = vld [vmem:[#allocation2 + $0x340] sm:$0xf]  ;;  %v4781_v3 = vld [vmem:[#allocation2 + $0x34c] sm:$0xf0]  ;;  %v3430_v6 = vor.u32 %v4749_v1, %v3429_v0  ;;  %1447 = vmatpush.bf16.msra.mxu0 %v3174_v4  ;;  %v3223_v63 = vld [vmem:[#allocation2 + $0xb0] sm:$0xf0] }
  0x24   :  { %v3157_v7 = vld [vmem:[#allocation2 + $0x20] sm:$0xf]  ;;  %v4681_v8 = vld [vmem:[#allocation2 + $0x2c] sm:$0xf0]  ;;  %v3558_v10 = vor.u32 %v4781_v3, %v3557_v2  ;;  %1460 = vmatpush.bf16.msra.mxu1 %v3302_v5  ;;  %v60_v2 = vld [vmem:[%s5461_s0 + $0x8] sm:$0xff] }
  0x25   :  { %v3285_v9 = vld [vmem:[#allocation2 + $0x120] sm:$0xf]  ;;  %v4713_v11 = vld [vmem:[#allocation2 + $0x12c] sm:$0xf0]  ;;  %v3158_v16 = vor.u32 %v4681_v8, %v3157_v7  ;;  %1473 = vmatpush.bf16.msra.mxu2 %v3430_v6  ;;  %v303_v8 = vunpack.c.l.b16 %v60_v2 }
  0x26   :  { %v3413_v12 = vld [vmem:[#allocation2 + $0x220] sm:$0xf]  ;;  %v4745_v13 = vld [vmem:[#allocation2 + $0x22c] sm:$0xf0]  ;;  %v3286_v19 = vor.u32 %v4713_v11, %v3285_v9  ;;  %1486 = vmatpush.bf16.msra.mxu3 %v3558_v10  ;;  %v304_v10 = vunpack.c.h.b16 %v60_v2  ;;  %v3226_v11 = vor.u32 %v4695_v62, %v3223_v63 }
  0x27   :  { %v3541_v14 = vld [vmem:[#allocation2 + $0x320] sm:$0xf]  ;;  %v4777_v15 = vld [vmem:[#allocation2 + $0x32c] sm:$0xf0]  ;;  %v3414_v20 = vor.u32 %v4745_v13, %v3413_v12  ;;  %1448 = vmatpush.bf16.msra.mxu0 %v3158_v16  ;;  %v4691_v16 = vld [vmem:[#allocation2 + $0x84] sm:$0xf] }
  0x28   :  { %v3141_v17 = vld [vmem:[#allocation2] sm:$0xf]  ;;  %v4677_v18 = vld [vmem:[#allocation2 + $0xc] sm:$0xf0]  ;;  %v3542_v24 = vor.u32 %v4777_v15, %v3541_v14  ;;  %1461 = vmatpush.bf16.msra.mxu1 %v3286_v19 }
  0x29   :  { %v3269_v21 = vld [vmem:[#allocation2 + $0x100] sm:$0xf]  ;;  %v4709_v22 = vld [vmem:[#allocation2 + $0x10c] sm:$0xf0]  ;;  %v3142_v31 = vor.u32 %v4677_v18, %v3141_v17  ;;  %1474 = vmatpush.bf16.msra.mxu2 %v3414_v20  ;;  %v3207_v17 = vld [vmem:[#allocation2 + $0x90] sm:$0xf0]  ;;  %v5201_v18 = vpack.c.b16 %v303_v8, %v303_v8  ;;  %v5205_v20 = vpack.c.b16 %v304_v10, %v304_v10 }
  0x2a   :  { %v3397_v23 = vld [vmem:[#allocation2 + $0x200] sm:$0xf]  ;;  %v4741_v25 = vld [vmem:[#allocation2 + $0x20c] sm:$0xf0]  ;;  %v3270_v35 = vor.u32 %v4709_v22, %v3269_v21  ;;  %1487 = vmatpush.bf16.msra.mxu3 %v3542_v24  ;;  %v4735_v8 = vld [vmem:[#allocation2 + $0x1e4] sm:$0xf] }
  0x2b   :  { %v3525_v26 = vld [vmem:[#allocation2 + $0x300] sm:$0xf]  ;;  %v4773_v27 = vld [vmem:[#allocation2 + $0x30c] sm:$0xf0]  ;;  %v3398_v36 = vor.u32 %v4741_v25, %v3397_v23  ;;  %1449 = vmatpush.bf16.msra.mxu0 %v3142_v31  ;;  %v4767_v10 = vld [vmem:[#allocation2 + $0x2e4] sm:$0xf] }
  0x2c   :  { %v3765_v28 = vld [vmem:[#allocation2 + $0x4e0] sm:$0xf]  ;;  %v4833_v29 = vld [vmem:[#allocation2 + $0x4ec] sm:$0xf0]  ;;  %v3526_v39 = vor.u32 %v4773_v27, %v3525_v26  ;;  %1462 = vmatpush.bf16.msra.mxu1 %v3270_v35 }
  0x2d   :  { %v3893_v30 = vld [vmem:[#allocation2 + $0x5e0] sm:$0xf]  ;;  %v4865_v32 = vld [vmem:[#allocation2 + $0x5ec] sm:$0xf0]  ;;  %v3766_v40 = vor.u32 %v4833_v29, %v3765_v28  ;;  %1475 = vmatpush.bf16.msra.mxu2 %v3398_v36  ;;  %v3210_v28 = vor.u32 %v4691_v16, %v3207_v17 }
  0x2e   :  { %v4021_v33 = vld [vmem:[#allocation2 + $0x6e0] sm:$0xf]  ;;  %v4897_v34 = vld [vmem:[#allocation2 + $0x6ec] sm:$0xf0]  ;;  %v3894_v41 = vor.u32 %v4865_v32, %v3893_v30  ;;  %1488 = vmatpush.bf16.msra.mxu3 %v3526_v39  ;;  %v4687_v32 = vld [vmem:[#allocation2 + $0x64] sm:$0xf] }
  0x2f   :  { %v4022_v42 = vor.u32 %v4897_v34, %v4021_v33  ;;  %v3749_v43 = vld [vmem:[#allocation2 + $0x4c0] sm:$0xf]  ;;  %v4829_v44 = vld [vmem:[#allocation2 + $0x4cc] sm:$0xf0]  ;;  %1494 = vmatpush.bf16.msrb.mxu0 %v3766_v40  ;;  %v3191_v33 = vld [vmem:[#allocation2 + $0x70] sm:$0xf0] }
  0x30   :  { %v3877_v45 = vld [vmem:[#allocation2 + $0x5c0] sm:$0xf]  ;;  %v4861_v47 = vld [vmem:[#allocation2 + $0x5cc] sm:$0xf0]  ;;  %v3750_v52 = vor.u32 %v4829_v44, %v3749_v43  ;;  %1507 = vmatpush.bf16.msrb.mxu1 %v3894_v41  ;;  %1476 = vmatmul.bf16.vlgmr.msra.gmra.mxu2 %v5201_v18  ;;  %v3194_v40 = vor.u32 %v4687_v32, %v3191_v33  ;;  %v4683_v44 = vld [vmem:[#allocation2 + $0x44] sm:$0xf] }
  0x31   :  { %v4005_v48 = vld [vmem:[#allocation2 + $0x6c0] sm:$0xf]  ;;  %v4893_v49 = vld [vmem:[#allocation2 + $0x6cc] sm:$0xf0]  ;;  %1520 = vmatpush.bf16.msrb.mxu2 %v4022_v42  ;;  %v3878_v54 = vor.u32 %v4861_v47, %v3877_v45  ;;  %1489 = vmatmul.bf16.vlgmr.msra.gmra.mxu3 %v5205_v20  ;;  %v3175_v45 = vld [vmem:[#allocation2 + $0x50] sm:$0xf0] }
  0x32   :  { %v3733_v53 = vld [vmem:[#allocation2 + $0x4a0] sm:$0xf]  ;;  %v4006_v55 = vor.u32 %v4893_v49, %v4005_v48  ;;  %v4825_v56 = vld [vmem:[#allocation2 + $0x4ac] sm:$0xf0]  ;;  %1533 = vmatpush.bf16.msrb.mxu3 %v3258_v46  ;;  %v4763_v32 = vld [vmem:[#allocation2 + $0x2c4] sm:$0xf] }
  0x33   :  { %v3861_v57 = vld [vmem:[#allocation2 + $0x5a0] sm:$0xf]  ;;  %v4857_v58 = vld [vmem:[#allocation2 + $0x5ac] sm:$0xf0]  ;;  %1495 = vmatpush.bf16.msrb.mxu0 %v3750_v52  ;;  %v3734_v0 = vor.u32 %v4825_v56, %v3733_v53  ;;  %v3178_v52 = vor.u32 %v4683_v44, %v3175_v45  ;;  %v4679_v56 = vld [vmem:[#allocation2 + $0x24] sm:$0xf] }
  0x34   :  { %v3989_v60 = vld [vmem:[#allocation2 + $0x6a0] sm:$0xf]  ;;  %v4889_v61 = vld [vmem:[#allocation2 + $0x6ac] sm:$0xf0]  ;;  %v3862_v1 = vor.u32 %v4857_v58, %v3861_v57  ;;  %1508 = vmatpush.bf16.msrb.mxu1 %v3878_v54  ;;  %v3159_v57 = vld [vmem:[#allocation2 + $0x30] sm:$0xf0] }
  0x35   :  { %v59_v3 = vld [vmem:[%s5461_s0] sm:$0xff]  ;;  %1521 = vmatpush.bf16.msrb.mxu2 %v4006_v55  ;;  %v3990_v4 = vor.u32 %v4889_v61, %v3989_v60  ;;  %v4821_v6 = vld [vmem:[#allocation2 + $0x48c] sm:$0xf0] }
  0x36   :  { %v3717_v5 = vld [vmem:[#allocation2 + $0x480] sm:$0xf]  ;;  %v301_v9 = vunpack.c.l.b16 %v59_v3  ;;  %1534 = vmatpush.bf16.msrb.mxu3 %v3242_v59  ;;  %v4853_v12 = vld [vmem:[#allocation2 + $0x58c] sm:$0xf0]  ;;  %v302_v15 = vunpack.c.h.b16 %v59_v3  ;;  %v62_v3 = vld [vmem:[%s5461_s0 + $0x18] sm:$0xf] }
  0x37   :  { %v3845_v7 = vld [vmem:[#allocation2 + $0x580] sm:$0xf]  ;;  %v4885_v14 = vld [vmem:[#allocation2 + $0x68c] sm:$0xf0]  ;;  %1496 = vmatpush.bf16.msrb.mxu0 %v3734_v0  ;;  %v3718_v21 = vor.u32 %v4821_v6, %v3717_v5  ;;  %v4675_v5 = vld [vmem:[#allocation2 + $0x4] sm:$0xf] }
  0x38   :  { %v3973_v13 = vld [vmem:[#allocation2 + $0x680] sm:$0xf]  ;;  %v5203_v19 = vpack.c.b16 %v301_v9, %v301_v9  ;;  %v5207_v22 = vpack.c.b16 %v302_v15, %v302_v15  ;;  %1509 = vmatpush.bf16.msrb.mxu1 %v3862_v1  ;;  %v3846_v23 = vor.u32 %v4853_v12, %v3845_v7  ;;  %v4817_v26 = vld [vmem:[#allocation2 + $0x46c] sm:$0xf0]  ;;  %v3143_v6 = vld [vmem:[#allocation2 + $0x10] sm:$0xf0]  ;;  %v307_v15 = vunpack.c.l.b16 %v62_v3 }
  0x39   :  { %1522 = vmatpush.bf16.msrb.mxu2 %v3990_v4  ;;  %v3974_v24 = vor.u32 %v4885_v14, %v3973_v13  ;;  %v3701_v25 = vld [vmem:[#allocation2 + $0x460] sm:$0xf]  ;;  %v4849_v29 = vld [vmem:[#allocation2 + $0x56c] sm:$0xf0]  ;;  %v3162_v4 = vor.u32 %v4679_v56, %v3159_v57  ;;  %v3383_v9 = vld [vmem:[#allocation2 + $0x1f0] sm:$0xf0] }
  0x3a   :  { %v3829_v27 = vld [vmem:[#allocation2 + $0x560] sm:$0xf]  ;;  %1535 = vmatpush.bf16.msrb.mxu3 %v3226_v11  ;;  %v4881_v31 = vld [vmem:[#allocation2 + $0x66c] sm:$0xf0]  ;;  %1450 = vmatmul.bf16.vlgmr.msra.gmra.mxu0 %v5203_v19  ;;  %v3702_v34 = vor.u32 %v4817_v26, %v3701_v25  ;;  %v3511_v12 = vld [vmem:[#allocation2 + $0x2f0] sm:$0xf0]  ;;  %v3146_v26 = vor.u32 %v4675_v5, %v3143_v6 }
  0x3b   :  { %v3957_v30 = vld [vmem:[#allocation2 + $0x660] sm:$0xf]  ;;  %1497 = vmatpush.bf16.msrb.mxu0 %v3718_v21  ;;  %1463 = vmatmul.bf16.vlgmr.msra.gmra.mxu1 %v5207_v22  ;;  %v3830_v35 = vor.u32 %v4849_v29, %v3829_v27  ;;  %v4813_v38 = vld [vmem:[#allocation2 + $0x44c] sm:$0xf0]  ;;  %v4799_v13 = vld [vmem:[#allocation2 + $0x3e4] sm:$0xf]  ;;  %v3386_v27 = vor.u32 %v4735_v8, %v3383_v9 }
  0x3c   :  { %1510 = vmatpush.bf16.msrb.mxu1 %v3846_v23  ;;  %v3958_v36 = vor.u32 %v4881_v31, %v3957_v30  ;;  %v3685_v37 = vld [vmem:[#allocation2 + $0x440] sm:$0xf]  ;;  %v4845_v41 = vld [vmem:[#allocation2 + $0x54c] sm:$0xf0]  ;;  %v3639_v14 = vld [vmem:[#allocation2 + $0x3f0] sm:$0xf0] }
  0x3d   :  { %1523 = vmatpush.bf16.msrb.mxu2 %v3974_v24  ;;  %v3813_v39 = vld [vmem:[#allocation2 + $0x540] sm:$0xf]  ;;  %v4877_v43 = vld [vmem:[#allocation2 + $0x64c] sm:$0xf0]  ;;  %v3686_v46 = vor.u32 %v4813_v38, %v3685_v37  ;;  %v4831_v21 = vld [vmem:[#allocation2 + $0x4e4] sm:$0xf]  ;;  %v3642_v29 = vor.u32 %v4799_v13, %v3639_v14  ;;  %v5219_v37 = vpack.c.b16 %v307_v15, %v307_v15 }
  0x3e   :  { %1536 = vmatpush.bf16.msrb.mxu3 %v3210_v28  ;;  %v3941_v42 = vld [vmem:[#allocation2 + $0x640] sm:$0xf]  ;;  %v3814_v47 = vor.u32 %v4845_v41, %v3813_v39  ;;  %v4809_v50 = vld [vmem:[#allocation2 + $0x42c] sm:$0xf0]  ;;  %v3767_v23 = vld [vmem:[#allocation2 + $0x4f0] sm:$0xf0]  ;;  %v3514_v28 = vor.u32 %v4767_v10, %v3511_v12 }
  0x3f   :  { %1498 = vmatpush.bf16.msrb.mxu0 %v3702_v34  ;;  %v3942_v48 = vor.u32 %v4877_v43, %v3941_v42  ;;  %v3669_v49 = vld [vmem:[#allocation2 + $0x420] sm:$0xf]  ;;  %v4841_v53 = vld [vmem:[#allocation2 + $0x52c] sm:$0xf0]  ;;  %v4731_v30 = vld [vmem:[#allocation2 + $0x1c4] sm:$0xf]  ;;  %v3770_v33 = vor.u32 %v4831_v21, %v3767_v23 }
  0x40   :  { %1511 = vmatpush.bf16.msrb.mxu1 %v3830_v35  ;;  %v3797_v51 = vld [vmem:[#allocation2 + $0x520] sm:$0xf]  ;;  %v4873_v55 = vld [vmem:[#allocation2 + $0x62c] sm:$0xf0]  ;;  %v3670_v59 = vor.u32 %v4809_v50, %v3669_v49  ;;  %v3367_v31 = vld [vmem:[#allocation2 + $0x1d0] sm:$0xf0] }
  0x41   :  { %1524 = vmatpush.bf16.msrb.mxu2 %v3958_v36  ;;  %v3925_v54 = vld [vmem:[#allocation2 + $0x620] sm:$0xf]  ;;  %v4805_v60 = vld [vmem:[#allocation2 + $0x40c] sm:$0xf0]  ;;  %v3798_v63 = vor.u32 %v4841_v53, %v3797_v51  ;;  %v3495_v34 = vld [vmem:[#allocation2 + $0x2d0] sm:$0xf0]  ;;  %v3370_v42 = vor.u32 %v4731_v30, %v3367_v31 }
  0x42   :  { %1537 = vmatpush.bf16.msrb.mxu3 %v3194_v40  ;;  %v3653_v58 = vld [vmem:[#allocation2 + $0x400] sm:$0xf]  ;;  %v4837_v62 = vld [vmem:[#allocation2 + $0x50c] sm:$0xf0]  ;;  %v3926_v0 = vor.u32 %v4873_v55, %v3925_v54  ;;  %v4795_v35 = vld [vmem:[#allocation2 + $0x3c4] sm:$0xf]  ;;  %v3498_v43 = vor.u32 %v4763_v32, %v3495_v34 }
  0x43   :  { %1499 = vmatpush.bf16.msrb.mxu0 %v3686_v46  ;;  %v3781_v61 = vld [vmem:[#allocation2 + $0x500] sm:$0xf]  ;;  %v4869_v2 = vld [vmem:[#allocation2 + $0x60c] sm:$0xf0]  ;;  %v3654_v11 = vor.u32 %v4805_v60, %v3653_v58  ;;  %v3623_v36 = vld [vmem:[#allocation2 + $0x3d0] sm:$0xf0] }
  0x44   :  { %1512 = vmatpush.bf16.msrb.mxu1 %v3814_v47  ;;  %v3909_v1 = vld [vmem:[#allocation2 + $0x600] sm:$0xf]  ;;  %v61_v7 = vld [vmem:[%s5461_s0 + $0x10] sm:$0xff]  ;;  %v3782_v16 = vor.u32 %v4837_v62, %v3781_v61  ;;  %v4827_v38 = vld [vmem:[#allocation2 + $0x4c4] sm:$0xf]  ;;  %v3626_v44 = vor.u32 %v4795_v35, %v3623_v36 }
  0x45   :  { %1525 = vmatpush.bf16.msrb.mxu2 %v3942_v48  ;;  %v3910_v17 = vor.u32 %v4869_v2, %v3909_v1  ;;  %v305_v24 = vunpack.c.l.b16 %v61_v7  ;;  %v306_v25 = vunpack.c.h.b16 %v61_v7  ;;  %v3751_v39 = vld [vmem:[#allocation2 + $0x4d0] sm:$0xf0]  ;;  %v4727_v45 = vld [vmem:[#allocation2 + $0x1a4] sm:$0xf] }
  0x46   :  { %1538 = vmatpush.bf16.msrb.mxu3 %v3178_v52  ;;  %v3351_v46 = vld [vmem:[#allocation2 + $0x1b0] sm:$0xf0]  ;;  %v4759_v47 = vld [vmem:[#allocation2 + $0x2a4] sm:$0xf]  ;;  %v3754_v48 = vor.u32 %v4827_v38, %v3751_v39 }
  0x47   :  { %1500 = vmatpush.bf16.msrb.mxu0 %v3670_v59  ;;  %v5221_v40 = vpack.c.b16 %v305_v24, %v305_v24  ;;  %v5223_v41 = vpack.c.b16 %v306_v25, %v306_v25  ;;  %v3479_v49 = vld [vmem:[#allocation2 + $0x2b0] sm:$0xf0]  ;;  %v4791_v50 = vld [vmem:[#allocation2 + $0x3a4] sm:$0xf]  ;;  %v3354_v54 = vor.u32 %v4727_v45, %v3351_v46 }
  0x48   :  { %1513 = vmatpush.bf16.msrb.mxu1 %v3798_v63  ;;  %v3607_v51 = vld [vmem:[#allocation2 + $0x3b0] sm:$0xf0]  ;;  %v4823_v52 = vld [vmem:[#allocation2 + $0x4a4] sm:$0xf]  ;;  %v3482_v55 = vor.u32 %v4759_v47, %v3479_v49 }
  0x49   :  { %1526 = vmatpush.bf16.msrb.mxu2 %v3926_v0  ;;  %v3735_v53 = vld [vmem:[#allocation2 + $0x4b0] sm:$0xf0]  ;;  %v3610_v56 = vor.u32 %v4791_v50, %v3607_v51  ;;  %v4723_v57 = vld [vmem:[#allocation2 + $0x184] sm:$0xf] }
  0x4a   :  { %1539 = vmatpush.bf16.msrb.mxu3 %v3162_v4  ;;  %v3335_v58 = vld [vmem:[#allocation2 + $0x190] sm:$0xf0]  ;;  %v4755_v59 = vld [vmem:[#allocation2 + $0x284] sm:$0xf]  ;;  %v3738_v60 = vor.u32 %v4823_v52, %v3735_v53 }
  0x4b   :  { %1501 = vmatpush.bf16.msrb.mxu0 %v3654_v11  ;;  %v3463_v61 = vld [vmem:[#allocation2 + $0x290] sm:$0xf0]  ;;  %v4787_v62 = vld [vmem:[#allocation2 + $0x384] sm:$0xf]  ;;  %v3338_v2 = vor.u32 %v4723_v57, %v3335_v58 }
  0x4c   :  { %1514 = vmatpush.bf16.msrb.mxu1 %v3782_v16  ;;  %v3591_v63 = vld [vmem:[#allocation2 + $0x390] sm:$0xf0]  ;;  %v4819_v0 = vld [vmem:[#allocation2 + $0x484] sm:$0xf]  ;;  %v3466_v3 = vor.u32 %v4755_v59, %v3463_v61 }
  0x4d   :  { %1527 = vmatpush.bf16.msrb.mxu2 %v3910_v17  ;;  %v3719_v1 = vld [vmem:[#allocation2 + $0x490] sm:$0xf0]  ;;  %v3594_v4 = vor.u32 %v4787_v62, %v3591_v63  ;;  %v4719_v5 = vld [vmem:[#allocation2 + $0x164] sm:$0xf]  ;;  %v3261_v62 = vld [vmem:[#allocation2 + $0xe8] sm:$0xf] }
  0x4e   :  { %1540 = vmatpush.bf16.msrb.mxu3 %v3146_v26  ;;  %1502 = vmatmul.bf16.vlgmr.msrb.gmra.mxu0 %v5221_v40  ;;  %v3319_v6 = vld [vmem:[#allocation2 + $0x170] sm:$0xf0]  ;;  %v4751_v7 = vld [vmem:[#allocation2 + $0x264] sm:$0xf]  ;;  %v3722_v8 = vor.u32 %v4819_v0, %v3719_v1  ;;  %v4706_v63 = vld [vmem:[#allocation2 + $0xf4] sm:$0xf0] }
  0x4f   :  { %1546 = vmatpush.bf16.msra.mxu0 %v3386_v27  ;;  %1515 = vmatmul.bf16.vlgmr.msrb.gmra.mxu1 %v5223_v41  ;;  %v3447_v9 = vld [vmem:[#allocation2 + $0x270] sm:$0xf0]  ;;  %v4783_v10 = vld [vmem:[#allocation2 + $0x364] sm:$0xf]  ;;  %v3322_v14 = vor.u32 %v4719_v5, %v3319_v6 }
  0x50   :  { %1559 = vmatpush.bf16.msra.mxu1 %v3514_v28  ;;  %1528 = vmatmul.bf16.vlgmr.msrb.gmra.mxu2 %v5219_v37  ;;  %v3575_v11 = vld [vmem:[#allocation2 + $0x370] sm:$0xf0]  ;;  %v4815_v12 = vld [vmem:[#allocation2 + $0x464] sm:$0xf]  ;;  %v3450_v15 = vor.u32 %v4751_v7, %v3447_v9  ;;  %v3262_v7 = vor.u32 %v4706_v63, %v3261_v62 }
  0x51   :  { %1572 = vmatpush.bf16.msra.mxu2 %v3642_v29  ;;  %1541 = vmatmul.bf16.vlgmr.msrb.gmra.mxu3 %v5203_v19  ;;  %v3703_v13 = vld [vmem:[#allocation2 + $0x470] sm:$0xf0]  ;;  %v3578_v16 = vor.u32 %v4783_v10, %v3575_v11  ;;  %v4715_v17 = vld [vmem:[#allocation2 + $0x144] sm:$0xf] }
  0x52   :  { %1585 = vmatpush.bf16.msra.mxu3 %v3770_v33  ;;  %v3303_v21 = vld [vmem:[#allocation2 + $0x150] sm:$0xf0]  ;;  %v4747_v23 = vld [vmem:[#allocation2 + $0x244] sm:$0xf]  ;;  %v3706_v24 = vor.u32 %v4815_v12, %v3703_v13  ;;  %v3245_v13 = vld [vmem:[#allocation2 + $0xc8] sm:$0xf] }
  0x53   :  { %1547 = vmatpush.bf16.msra.mxu0 %v3370_v42  ;;  %v3431_v25 = vld [vmem:[#allocation2 + $0x250] sm:$0xf0]  ;;  %v4779_v26 = vld [vmem:[#allocation2 + $0x344] sm:$0xf]  ;;  %v3306_v30 = vor.u32 %v4715_v17, %v3303_v21 }
  0x54   :  { %1560 = vmatpush.bf16.msra.mxu1 %v3498_v43  ;;  %v3559_v27 = vld [vmem:[#allocation2 + $0x350] sm:$0xf0]  ;;  %v4811_v28 = vld [vmem:[#allocation2 + $0x444] sm:$0xf]  ;;  %v3434_v31 = vor.u32 %v4747_v23, %v3431_v25 }
  0x55   :  { %1573 = vmatpush.bf16.msra.mxu2 %v3626_v44  ;;  %v3687_v29 = vld [vmem:[#allocation2 + $0x450] sm:$0xf0]  ;;  %v3562_v32 = vor.u32 %v4779_v26, %v3559_v27  ;;  %v4711_v33 = vld [vmem:[#allocation2 + $0x124] sm:$0xf] }
  0x56   :  { %1586 = vmatpush.bf16.msra.mxu3 %v3754_v48  ;;  %v3287_v34 = vld [vmem:[#allocation2 + $0x130] sm:$0xf0]  ;;  %v4743_v35 = vld [vmem:[#allocation2 + $0x224] sm:$0xf]  ;;  %v3690_v36 = vor.u32 %v4811_v28, %v3687_v29  ;;  %v3229_v29 = vld [vmem:[#allocation2 + $0xa8] sm:$0xf] }
  0x57   :  { %1548 = vmatpush.bf16.msra.mxu0 %v3354_v54  ;;  %v3415_v38 = vld [vmem:[#allocation2 + $0x230] sm:$0xf0]  ;;  %v4775_v39 = vld [vmem:[#allocation2 + $0x324] sm:$0xf]  ;;  %v3290_v45 = vor.u32 %v4711_v33, %v3287_v34 }
  0x58   :  { %1561 = vmatpush.bf16.msra.mxu1 %v3482_v55  ;;  %v3543_v42 = vld [vmem:[#allocation2 + $0x330] sm:$0xf0]  ;;  %v4807_v43 = vld [vmem:[#allocation2 + $0x424] sm:$0xf]  ;;  %v3418_v48 = vor.u32 %v4743_v35, %v3415_v38 }
  0x59   :  { %1574 = vmatpush.bf16.msra.mxu2 %v3610_v56  ;;  %v3671_v44 = vld [vmem:[#allocation2 + $0x430] sm:$0xf0]  ;;  %v4707_v46 = vld [vmem:[#allocation2 + $0x104] sm:$0xf]  ;;  %v3546_v49 = vor.u32 %v4775_v39, %v3543_v42 }
  0x5a   :  { %1587 = vmatpush.bf16.msra.mxu3 %v3738_v60  ;;  %v3271_v47 = vld [vmem:[#allocation2 + $0x110] sm:$0xf0]  ;;  %v4739_v50 = vld [vmem:[#allocation2 + $0x204] sm:$0xf]  ;;  %v3674_v53 = vor.u32 %v4807_v43, %v3671_v44  ;;  %v3213_v44 = vld [vmem:[#allocation2 + $0x88] sm:$0xf] }
  0x5b   :  { %1549 = vmatpush.bf16.msra.mxu0 %v3338_v2  ;;  %v3399_v51 = vld [vmem:[#allocation2 + $0x210] sm:$0xf0]  ;;  %v4771_v52 = vld [vmem:[#allocation2 + $0x304] sm:$0xf]  ;;  %v3274_v60 = vor.u32 %v4707_v46, %v3271_v47  ;;  %v3389_v2 = vld [vmem:[#allocation2 + $0x1e8] sm:$0xf] }
  0x5c   :  { %1562 = vmatpush.bf16.msra.mxu1 %v3466_v3  ;;  %v3527_v54 = vld [vmem:[#allocation2 + $0x310] sm:$0xf0]  ;;  %v4803_v55 = vld [vmem:[#allocation2 + $0x404] sm:$0xf]  ;;  %v3402_v0 = vor.u32 %v4739_v50, %v3399_v51  ;;  %v4738_v3 = vld [vmem:[#allocation2 + $0x1f4] sm:$0xf0] }
  0x5d   :  { %1575 = vmatpush.bf16.msra.mxu2 %v3594_v4  ;;  %v3655_v56 = vld [vmem:[#allocation2 + $0x410] sm:$0xf0]  ;;  %v4863_v57 = vld [vmem:[#allocation2 + $0x5e4] sm:$0xf]  ;;  %v3530_v1 = vor.u32 %v4771_v52, %v3527_v54  ;;  %v3390_v11 = vor.u32 %v4738_v3, %v3389_v2  ;;  %v3341_v46 = vld [vmem:[#allocation2 + $0x188] sm:$0xf] }
  0x5e   :  { %1588 = vmatpush.bf16.msra.mxu3 %v3722_v8  ;;  %v3895_v58 = vld [vmem:[#allocation2 + $0x5f0] sm:$0xf0]  ;;  %v4895_v59 = vld [vmem:[#allocation2 + $0x6e4] sm:$0xf]  ;;  %v3658_v4 = vor.u32 %v4803_v55, %v3655_v56  ;;  %v4726_v47 = vld [vmem:[#allocation2 + $0x194] sm:$0xf0] }
  0x5f   :  { %1550 = vmatpush.bf16.msra.mxu0 %v3322_v14  ;;  %v4023_v61 = vld [vmem:[#allocation2 + $0x6f0] sm:$0xf0]  ;;  %v3898_v5 = vor.u32 %v4863_v57, %v3895_v58  ;;  %v4859_v8 = vld [vmem:[#allocation2 + $0x5c4] sm:$0xf]  ;;  %v4702_v14 = vld [vmem:[#allocation2 + $0xd4] sm:$0xf0]  ;;  %v3342_v54 = vor.u32 %v4726_v47, %v3341_v46 }
  0x60   :  { %1563 = vmatpush.bf16.msra.mxu1 %v3450_v15  ;;  %v4026_v6 = vor.u32 %v4895_v59, %v4023_v61  ;;  %v3879_v9 = vld [vmem:[#allocation2 + $0x5d0] sm:$0xf0]  ;;  %v4891_v10 = vld [vmem:[#allocation2 + $0x6c4] sm:$0xf]  ;;  %v3373_v15 = vld [vmem:[#allocation2 + $0x1c8] sm:$0xf]  ;;  %v3246_v23 = vor.u32 %v4702_v14, %v3245_v13 }
  0x61   :  { %1576 = vmatpush.bf16.msra.mxu2 %v3578_v16  ;;  %v4007_v12 = vld [vmem:[#allocation2 + $0x6d0] sm:$0xf0]  ;;  %v4734_v16 = vld [vmem:[#allocation2 + $0x1d4] sm:$0xf0]  ;;  %v3882_v17 = vor.u32 %v4859_v8, %v3879_v9  ;;  %v4887_v26 = vld [vmem:[#allocation2 + $0x6a4] sm:$0xf] }
  0x62   :  { %1589 = vmatpush.bf16.msra.mxu3 %v3706_v24  ;;  %v4010_v21 = vor.u32 %v4891_v10, %v4007_v12  ;;  %v4855_v24 = vld [vmem:[#allocation2 + $0x5a4] sm:$0xf]  ;;  %v3863_v25 = vld [vmem:[#allocation2 + $0x5b0] sm:$0xf0]  ;;  %v3374_v27 = vor.u32 %v4734_v16, %v3373_v15  ;;  %v3197_v56 = vld [vmem:[#allocation2 + $0x68] sm:$0xf] }
  0x63   :  { %1551 = vmatpush.bf16.msra.mxu0 %v3306_v30  ;;  %v3991_v28 = vld [vmem:[#allocation2 + $0x6b0] sm:$0xf0]  ;;  %v4698_v30 = vld [vmem:[#allocation2 + $0xb4] sm:$0xf0]  ;;  %v3866_v33 = vor.u32 %v4855_v24, %v3863_v25  ;;  %v4883_v39 = vld [vmem:[#allocation2 + $0x684] sm:$0xf] }
  0x64   :  { %1564 = vmatpush.bf16.msra.mxu1 %v3434_v31  ;;  %v3357_v31 = vld [vmem:[#allocation2 + $0x1a8] sm:$0xf]  ;;  %v3994_v34 = vor.u32 %v4887_v26, %v3991_v28  ;;  %v3230_v35 = vor.u32 %v4698_v30, %v3229_v29  ;;  %v3847_v38 = vld [vmem:[#allocation2 + $0x590] sm:$0xf0]  ;;  %v4847_v51 = vld [vmem:[#allocation2 + $0x564] sm:$0xf] }
  0x65   :  { %1577 = vmatpush.bf16.msra.mxu2 %v3562_v32  ;;  %v4730_v32 = vld [vmem:[#allocation2 + $0x1b4] sm:$0xf0]  ;;  %v3975_v43 = vld [vmem:[#allocation2 + $0x690] sm:$0xf0]  ;;  %v3325_v58 = vld [vmem:[#allocation2 + $0x168] sm:$0xf] }
  0x66   :  { %1590 = vmatpush.bf16.msra.mxu3 %v3690_v36  ;;  %v4851_v36 = vld [vmem:[#allocation2 + $0x584] sm:$0xf]  ;;  %v3358_v42 = vor.u32 %v4730_v32, %v3357_v31  ;;  %v3831_v52 = vld [vmem:[#allocation2 + $0x570] sm:$0xf0]  ;;  %v4690_v57 = vld [vmem:[#allocation2 + $0x74] sm:$0xf0] }
  0x67   :  { %1552 = vmatpush.bf16.msra.mxu0 %v3290_v45  ;;  %v4694_v45 = vld [vmem:[#allocation2 + $0x94] sm:$0xf0]  ;;  %v3959_v55 = vld [vmem:[#allocation2 + $0x670] sm:$0xf0]  ;;  %v3198_v62 = vor.u32 %v4690_v57, %v3197_v56  ;;  %v4843_v63 = vld [vmem:[#allocation2 + $0x544] sm:$0xf] }
  0x68   :  { %1565 = vmatpush.bf16.msra.mxu1 %v3418_v48  ;;  %v3850_v48 = vor.u32 %v4851_v36, %v3847_v38  ;;  %v3214_v50 = vor.u32 %v4694_v45, %v3213_v44  ;;  %v4722_v59 = vld [vmem:[#allocation2 + $0x174] sm:$0xf0]  ;;  %v3943_v3 = vld [vmem:[#allocation2 + $0x650] sm:$0xf0]  ;;  %v4871_v13 = vld [vmem:[#allocation2 + $0x624] sm:$0xf] }
  0x69   :  { %1578 = vmatpush.bf16.msra.mxu2 %v3546_v49  ;;  %v3978_v49 = vor.u32 %v4883_v39, %v3975_v43  ;;  %v3326_v2 = vor.u32 %v4722_v59, %v3325_v58  ;;  %v3799_v12 = vld [vmem:[#allocation2 + $0x530] sm:$0xf0]  ;;  %v3165_v16 = vld [vmem:[#allocation2 + $0x28] sm:$0xf]  ;;  %v4835_v25 = vld [vmem:[#allocation2 + $0x504] sm:$0xf] }
  0x6a   :  { %1591 = vmatpush.bf16.msra.mxu3 %v3674_v53  ;;  %v4879_v53 = vld [vmem:[#allocation2 + $0x664] sm:$0xf]  ;;  %v3927_v15 = vld [vmem:[#allocation2 + $0x630] sm:$0xf0]  ;;  %v3149_v31 = vld [vmem:[#allocation2 + $0x8] sm:$0xf] }
  0x6b   :  { %1553 = vmatpush.bf16.msra.mxu0 %v3274_v60  ;;  %v3834_v60 = vor.u32 %v4847_v51, %v3831_v52  ;;  %v3962_v61 = vor.u32 %v4879_v53, %v3959_v55  ;;  %v3783_v26 = vld [vmem:[#allocation2 + $0x510] sm:$0xf0]  ;;  %v4867_v29 = vld [vmem:[#allocation2 + $0x604] sm:$0xf]  ;;  %v3517_v36 = vld [vmem:[#allocation2 + $0x2e8] sm:$0xf] }
  0x6c   :  { %1566 = vmatpush.bf16.msra.mxu1 %v3402_v0  ;;  %v3815_v0 = vld [vmem:[#allocation2 + $0x550] sm:$0xf0]  ;;  %v4770_v38 = vld [vmem:[#allocation2 + $0x2f4] sm:$0xf0]  ;;  %v3645_v39 = vld [vmem:[#allocation2 + $0x3e8] sm:$0xf] }
  0x6d   :  { %1579 = vmatpush.bf16.msra.mxu2 %v3530_v1  ;;  %v4875_v1 = vld [vmem:[#allocation2 + $0x644] sm:$0xf]  ;;  %v3818_v8 = vor.u32 %v4843_v63, %v3815_v0  ;;  %v3911_v30 = vld [vmem:[#allocation2 + $0x610] sm:$0xf0]  ;;  %v4802_v43 = vld [vmem:[#allocation2 + $0x3f4] sm:$0xf0]  ;;  %v3518_v51 = vor.u32 %v4770_v38, %v3517_v36 }
  0x6e   :  { %1592 = vmatpush.bf16.msra.mxu3 %v3658_v4  ;;  %1554 = vmatmul.bf16.vlgmr.msra.gmra.mxu0 %v5207_v22  ;;  %v3181_v4 = vld [vmem:[#allocation2 + $0x48] sm:$0xf]  ;;  %v3946_v9 = vor.u32 %v4875_v1, %v3943_v3  ;;  %v4834_v45 = vld [vmem:[#allocation2 + $0x4f4] sm:$0xf0]  ;;  %v3914_v46 = vor.u32 %v4867_v29, %v3911_v30  ;;  %v3646_v52 = vor.u32 %v4802_v43, %v3645_v39 }
  0x6f   :  { %1598 = vmatpush.bf16.msrb.mxu0 %v3898_v5  ;;  %1567 = vmatmul.bf16.vlgmr.msra.gmra.mxu1 %v5201_v18  ;;  %v4686_v5 = vld [vmem:[#allocation2 + $0x54] sm:$0xf0]  ;;  %v3773_v44 = vld [vmem:[#allocation2 + $0x4e8] sm:$0xf] }
  0x70   :  { %1611 = vmatpush.bf16.msrb.mxu1 %v4026_v6  ;;  %1580 = vmatmul.bf16.vlgmr.msra.gmra.mxu2 %v5205_v20  ;;  %v3309_v6 = vld [vmem:[#allocation2 + $0x148] sm:$0xf]  ;;  %v3182_v10 = vor.u32 %v4686_v5, %v3181_v4  ;;  %v3774_v53 = vor.u32 %v4834_v45, %v3773_v44  ;;  %v4766_v55 = vld [vmem:[#allocation2 + $0x2d4] sm:$0xf0] }
  0x71   :  { %1624 = vmatpush.bf16.msrb.mxu2 %v3262_v7  ;;  %1593 = vmatmul.bf16.vlgmr.msra.gmra.mxu3 %v5221_v40  ;;  %v4718_v7 = vld [vmem:[#allocation2 + $0x154] sm:$0xf0]  ;;  %v3629_v56 = vld [vmem:[#allocation2 + $0x3c8] sm:$0xf] }
  0x72   :  { %1637 = vmatpush.bf16.msrb.mxu3 %v3390_v11  ;;  %v4839_v11 = vld [vmem:[#allocation2 + $0x524] sm:$0xf]  ;;  %v3310_v14 = vor.u32 %v4718_v7, %v3309_v6  ;;  %v4798_v58 = vld [vmem:[#allocation2 + $0x3d4] sm:$0xf0]  ;;  %v3757_v59 = vld [vmem:[#allocation2 + $0x4c8] sm:$0xf] }
  0x73   :  { %1599 = vmatpush.bf16.msrb.mxu0 %v3882_v17  ;;  %v4682_v17 = vld [vmem:[#allocation2 + $0x34] sm:$0xf0]  ;;  %v3802_v24 = vor.u32 %v4839_v11, %v3799_v12  ;;  %v3630_v0 = vor.u32 %v4798_v58, %v3629_v56  ;;  %v3613_v4 = vld [vmem:[#allocation2 + $0x3a8] sm:$0xf] }
  0x74   :  { %1612 = vmatpush.bf16.msrb.mxu1 %v4010_v21  ;;  %v3293_v21 = vld [vmem:[#allocation2 + $0x128] sm:$0xf]  ;;  %v3166_v28 = vor.u32 %v4682_v17, %v3165_v16  ;;  %v4762_v3 = vld [vmem:[#allocation2 + $0x2b4] sm:$0xf0] }
  0x75   :  { %1625 = vmatpush.bf16.msrb.mxu2 %v3246_v23  ;;  %v4714_v23 = vld [vmem:[#allocation2 + $0x134] sm:$0xf0]  ;;  %v3741_v7 = vld [vmem:[#allocation2 + $0x4a8] sm:$0xf] }
  0x76   :  { %1638 = vmatpush.bf16.msrb.mxu3 %v3374_v27  ;;  %v3930_v27 = vor.u32 %v4871_v13, %v3927_v15  ;;  %v3294_v32 = vor.u32 %v4714_v23, %v3293_v21  ;;  %v4794_v6 = vld [vmem:[#allocation2 + $0x3b4] sm:$0xf0]  ;;  %v3597_v16 = vld [vmem:[#allocation2 + $0x388] sm:$0xf] }
  0x77   :  { %1600 = vmatpush.bf16.msrb.mxu0 %v3866_v33  ;;  %v4678_v33 = vld [vmem:[#allocation2 + $0x14] sm:$0xf0]  ;;  %v3614_v12 = vor.u32 %v4794_v6, %v3613_v4  ;;  %v3725_v23 = vld [vmem:[#allocation2 + $0x488] sm:$0xf] }
  0x78   :  { %1613 = vmatpush.bf16.msrb.mxu1 %v3994_v34  ;;  %v3277_v34 = vld [vmem:[#allocation2 + $0x108] sm:$0xf]  ;;  %v3150_v47 = vor.u32 %v4678_v33, %v3149_v31  ;;  %v4758_v15 = vld [vmem:[#allocation2 + $0x294] sm:$0xf0] }
  0x79   :  { %1626 = vmatpush.bf16.msrb.mxu2 %v3230_v35  ;;  %v4710_v35 = vld [vmem:[#allocation2 + $0x114] sm:$0xf0]  ;;  %v3453_v30 = vld [vmem:[#allocation2 + $0x268] sm:$0xf] }
  0x7a   :  { %1639 = vmatpush.bf16.msrb.mxu3 %v3358_v42  ;;  %v3786_v42 = vor.u32 %v4835_v25, %v3783_v26  ;;  %v4790_v21 = vld [vmem:[#allocation2 + $0x394] sm:$0xf0]  ;;  %v3853_v25 = vld [vmem:[#allocation2 + $0x588] sm:$0xf] }
  0x7b   :  { %1601 = vmatpush.bf16.msrb.mxu0 %v3850_v48  ;;  %v3901_v48 = vld [vmem:[#allocation2 + $0x5e8] sm:$0xf]  ;;  %v4854_v26 = vld [vmem:[#allocation2 + $0x594] sm:$0xf0] }
  0x7c   :  { %1614 = vmatpush.bf16.msrb.mxu1 %v3978_v49  ;;  %v4866_v49 = vld [vmem:[#allocation2 + $0x5f4] sm:$0xf0]  ;;  %v3854_v33 = vor.u32 %v4854_v26, %v3853_v25  ;;  %v3837_v38 = vld [vmem:[#allocation2 + $0x568] sm:$0xf] }
  0x7d   :  { %1627 = vmatpush.bf16.msrb.mxu2 %v3214_v50  ;;  %v3278_v50 = vor.u32 %v4710_v35, %v3277_v34  ;;  %v3902_v57 = vor.u32 %v4866_v49, %v3901_v48  ;;  %v4754_v31 = vld [vmem:[#allocation2 + $0x274] sm:$0xf0]  ;;  %v3709_v35 = vld [vmem:[#allocation2 + $0x468] sm:$0xf] }
  0x7e   :  { %1640 = vmatpush.bf16.msrb.mxu3 %v3342_v54  ;;  %v3501_v54 = vld [vmem:[#allocation2 + $0x2c8] sm:$0xf]  ;;  %v4786_v34 = vld [vmem:[#allocation2 + $0x374] sm:$0xf0] }
  0x7f   :  { %1602 = vmatpush.bf16.msrb.mxu0 %v3834_v60  ;;  %v4830_v60 = vld [vmem:[#allocation2 + $0x4d4] sm:$0xf0]  ;;  %v3502_v63 = vor.u32 %v4766_v55, %v3501_v54  ;;  %v3437_v45 = vld [vmem:[#allocation2 + $0x248] sm:$0xf] }
  0x80   :  { %1615 = vmatpush.bf16.msrb.mxu1 %v3962_v61  ;;  %v3885_v61 = vld [vmem:[#allocation2 + $0x5c8] sm:$0xf]  ;;  %v3758_v1 = vor.u32 %v4830_v60, %v3757_v59  ;;  %v4818_v36 = vld [vmem:[#allocation2 + $0x474] sm:$0xf0] }
  0x81   :  { %1628 = vmatpush.bf16.msrb.mxu2 %v3198_v62  ;;  %v4862_v62 = vld [vmem:[#allocation2 + $0x5d4] sm:$0xf0]  ;;  %v3710_v44 = vor.u32 %v4818_v36, %v3709_v35  ;;  %v3549_v59 = vld [vmem:[#allocation2 + $0x328] sm:$0xf]  ;;  %v4700_v35 = vld [vmem:[#allocation2 + $0xcc] sm:$0xf] }
  0x82   :  { %1641 = vmatpush.bf16.msrb.mxu3 %v3326_v2  ;;  %v3485_v2 = vld [vmem:[#allocation2 + $0x2a8] sm:$0xf]  ;;  %v3886_v5 = vor.u32 %v4862_v62, %v3885_v61  ;;  %v4850_v39 = vld [vmem:[#allocation2 + $0x574] sm:$0xf0] }
  0x83   :  { %1603 = vmatpush.bf16.msrb.mxu0 %v3818_v8  ;;  %v4826_v8 = vld [vmem:[#allocation2 + $0x4b4] sm:$0xf0]  ;;  %v3486_v11 = vor.u32 %v4762_v3, %v3485_v2  ;;  %v3838_v48 = vor.u32 %v4850_v39, %v3837_v38  ;;  %v3677_v62 = vld [vmem:[#allocation2 + $0x428] sm:$0xf]  ;;  %v3247_v38 = vld [vmem:[#allocation2 + $0xd8] sm:$0xf0] }
  0x84   :  { %1616 = vmatpush.bf16.msrb.mxu1 %v3946_v9  ;;  %v3869_v9 = vld [vmem:[#allocation2 + $0x5a8] sm:$0xf]  ;;  %v3742_v13 = vor.u32 %v4826_v8, %v3741_v7  ;;  %v4782_v49 = vld [vmem:[#allocation2 + $0x354] sm:$0xf0]  ;;  %v4732_v39 = vld [vmem:[#allocation2 + $0x1cc] sm:$0xf] }
  0x85   :  { %1629 = vmatpush.bf16.msrb.mxu2 %v3182_v10  ;;  %v4858_v10 = vld [vmem:[#allocation2 + $0x5b4] sm:$0xf0]  ;;  %v3405_v3 = vld [vmem:[#allocation2 + $0x208] sm:$0xf] }
  0x86   :  { %1642 = vmatpush.bf16.msrb.mxu3 %v3310_v14  ;;  %v3469_v14 = vld [vmem:[#allocation2 + $0x288] sm:$0xf]  ;;  %v3870_v17 = vor.u32 %v4858_v10, %v3869_v9  ;;  %v4746_v58 = vld [vmem:[#allocation2 + $0x234] sm:$0xf0] }
  0x87   :  { %1604 = vmatpush.bf16.msrb.mxu0 %v3802_v24  ;;  %v4822_v24 = vld [vmem:[#allocation2 + $0x494] sm:$0xf0]  ;;  %v3533_v7 = vld [vmem:[#allocation2 + $0x308] sm:$0xf] }
  0x88   :  { %1617 = vmatpush.bf16.msrb.mxu1 %v3930_v27  ;;  %v3470_v27 = vor.u32 %v4758_v15, %v3469_v14  ;;  %v3726_v29 = vor.u32 %v4822_v24, %v3725_v23  ;;  %v4778_v61 = vld [vmem:[#allocation2 + $0x334] sm:$0xf0]  ;;  %v3661_v9 = vld [vmem:[#allocation2 + $0x408] sm:$0xf]  ;;  %v4736_v23 = vld [vmem:[#allocation2 + $0x1ec] sm:$0xf] }
  0x89   :  { %1630 = vmatpush.bf16.msrb.mxu2 %v3166_v28  ;;  %v3598_v28 = vor.u32 %v4790_v21, %v3597_v16  ;;  %v4742_v4 = vld [vmem:[#allocation2 + $0x214] sm:$0xf0]  ;;  %v4029_v14 = vld [vmem:[#allocation2 + $0x6e8] sm:$0xf]  ;;  %v4704_v16 = vld [vmem:[#allocation2 + $0xec] sm:$0xf] }
  0x8a   :  { %1643 = vmatpush.bf16.msrb.mxu3 %v3294_v32  ;;  %v3581_v32 = vld [vmem:[#allocation2 + $0x368] sm:$0xf]  ;;  %v4774_v8 = vld [vmem:[#allocation2 + $0x314] sm:$0xf0]  ;;  %v3263_v21 = vld [vmem:[#allocation2 + $0xf8] sm:$0xf0] }
  0x8b   :  { %1605 = vmatpush.bf16.msrb.mxu0 %v3786_v42  ;;  %v3454_v42 = vor.u32 %v4754_v31, %v3453_v30  ;;  %v3582_v43 = vor.u32 %v4786_v34, %v3581_v32  ;;  %v4898_v15 = vld [vmem:[#allocation2 + $0x6f4] sm:$0xf0]  ;;  %v3391_v24 = vld [vmem:[#allocation2 + $0x1f8] sm:$0xf0]  ;;  %v3534_v25 = vor.u32 %v4774_v8, %v3533_v7  ;;  %v3266_v31 = vor.u32 %v4704_v16, %v3263_v21  ;;  %v3965_v8 = vld [vmem:[#allocation2 + $0x668] sm:$0xf] }
  0x8c   :  { %1618 = vmatpush.bf16.msrb.mxu1 %v3914_v46  ;;  %v4750_v46 = vld [vmem:[#allocation2 + $0x254] sm:$0xf0]  ;;  %v4030_v30 = vor.u32 %v4898_v15, %v4029_v14  ;;  %v3394_v32 = vor.u32 %v4736_v23, %v3391_v24  ;;  %v3327_v14 = vld [vmem:[#allocation2 + $0x178] sm:$0xf0]  ;;  %v4752_v15 = vld [vmem:[#allocation2 + $0x26c] sm:$0xf] }
  0x8d   :  { %1631 = vmatpush.bf16.msrb.mxu2 %v3150_v47  ;;  %v3565_v47 = vld [vmem:[#allocation2 + $0x348] sm:$0xf]  ;;  %v3438_v54 = vor.u32 %v4750_v46, %v3437_v45  ;;  %v4894_v34 = vld [vmem:[#allocation2 + $0x6d4] sm:$0xf0]  ;;  %v3250_v46 = vor.u32 %v4700_v35, %v3247_v38  ;;  %v3455_v16 = vld [vmem:[#allocation2 + $0x278] sm:$0xf0] }
  0x8e   :  { %1644 = vmatpush.bf16.msrb.mxu3 %v3278_v50  ;;  %1606 = vmatmul.bf16.vlgmr.msrb.gmra.mxu0 %v5223_v41  ;;  %v3693_v50 = vld [vmem:[#allocation2 + $0x448] sm:$0xf]  ;;  %v3566_v55 = vor.u32 %v4782_v49, %v3565_v47  ;;  %v4890_v49 = vld [vmem:[#allocation2 + $0x6b4] sm:$0xf0] }
  0x8f   :  { %1650 = vmatpush.bf16.msra.mxu0 %v3518_v51  ;;  %1619 = vmatmul.bf16.vlgmr.msrb.gmra.mxu1 %v5219_v37  ;;  %v4814_v51 = vld [vmem:[#allocation2 + $0x454] sm:$0xf0]  ;;  %v3949_v24 = vld [vmem:[#allocation2 + $0x648] sm:$0xf] }
  0x90   :  { %1663 = vmatpush.bf16.msra.mxu1 %v3646_v52  ;;  %1632 = vmatmul.bf16.vlgmr.msrb.gmra.mxu2 %v5203_v19  ;;  %v3821_v52 = vld [vmem:[#allocation2 + $0x548] sm:$0xf]  ;;  %v3694_v56 = vor.u32 %v4814_v51, %v3693_v50  ;;  %v4696_v50 = vld [vmem:[#allocation2 + $0xac] sm:$0xf] }
  0x91   :  { %1676 = vmatpush.bf16.msra.mxu2 %v3774_v53  ;;  %1645 = vmatmul.bf16.vlgmr.msrb.gmra.mxu3 %v5207_v22  ;;  %v4846_v53 = vld [vmem:[#allocation2 + $0x554] sm:$0xf0]  ;;  %v3933_v38 = vld [vmem:[#allocation2 + $0x628] sm:$0xf] }
  0x92   :  { %1689 = vmatpush.bf16.msra.mxu3 %v3902_v57  ;;  %v3421_v57 = vld [vmem:[#allocation2 + $0x228] sm:$0xf]  ;;  %v3822_v60 = vor.u32 %v4846_v53, %v3821_v52  ;;  %v3231_v52 = vld [vmem:[#allocation2 + $0xb8] sm:$0xf0]  ;;  %v4728_v53 = vld [vmem:[#allocation2 + $0x1ac] sm:$0xf] }
  0x93   :  { %1651 = vmatpush.bf16.msra.mxu0 %v3502_v63  ;;  %v4810_v63 = vld [vmem:[#allocation2 + $0x434] sm:$0xf0]  ;;  %v3422_v2 = vor.u32 %v4746_v58, %v3421_v57  ;;  %v3234_v58 = vor.u32 %v4696_v50, %v3231_v52 }
  0x94   :  { %1664 = vmatpush.bf16.msra.mxu1 %v3630_v0  ;;  %v3805_v0 = vld [vmem:[#allocation2 + $0x528] sm:$0xf]  ;;  %v3678_v6 = vor.u32 %v4810_v63, %v3677_v62  ;;  %v4692_v62 = vld [vmem:[#allocation2 + $0x8c] sm:$0xf]  ;;  %v4870_v52 = vld [vmem:[#allocation2 + $0x614] sm:$0xf0] }
  0x95   :  { %1677 = vmatpush.bf16.msra.mxu2 %v3758_v1  ;;  %v4842_v1 = vld [vmem:[#allocation2 + $0x534] sm:$0xf0] }
  0x96   :  { %1690 = vmatpush.bf16.msra.mxu3 %v3886_v5  ;;  %v3550_v5 = vor.u32 %v4778_v61, %v3549_v59  ;;  %v3806_v10 = vor.u32 %v4842_v1, %v3805_v0  ;;  %v4886_v61 = vld [vmem:[#allocation2 + $0x694] sm:$0xf0]  ;;  %v3215_v0 = vld [vmem:[#allocation2 + $0x98] sm:$0xf0]  ;;  %v4724_v1 = vld [vmem:[#allocation2 + $0x18c] sm:$0xf] }
  0x97   :  { %1652 = vmatpush.bf16.msra.mxu0 %v3486_v11  ;;  %v4806_v11 = vld [vmem:[#allocation2 + $0x414] sm:$0xf0] }
  0x98   :  { %1665 = vmatpush.bf16.msra.mxu1 %v3614_v12  ;;  %v3789_v12 = vld [vmem:[#allocation2 + $0x508] sm:$0xf]  ;;  %v3662_v26 = vor.u32 %v4806_v11, %v3661_v9  ;;  %v4882_v9 = vld [vmem:[#allocation2 + $0x674] sm:$0xf0] }
  0x99   :  { %1678 = vmatpush.bf16.msra.mxu2 %v3742_v13  ;;  %v4838_v13 = vld [vmem:[#allocation2 + $0x514] sm:$0xf0] }
  0x9a   :  { %1691 = vmatpush.bf16.msra.mxu3 %v3870_v17  ;;  %v3406_v17 = vor.u32 %v4742_v4, %v3405_v3  ;;  %v4756_v3 = vld [vmem:[#allocation2 + $0x28c] sm:$0xf]  ;;  %v3471_v4 = vld [vmem:[#allocation2 + $0x298] sm:$0xf0] }
  0x9b   :  { %1653 = vmatpush.bf16.msra.mxu0 %v3470_v27  ;;  %v4768_v27 = vld [vmem:[#allocation2 + $0x2ec] sm:$0xf]  ;;  %v3474_v11 = vor.u32 %v4756_v3, %v3471_v4  ;;  %v3775_v4 = vld [vmem:[#allocation2 + $0x4f8] sm:$0xf0] }
  0x9c   :  { %1666 = vmatpush.bf16.msra.mxu1 %v3598_v28  ;;  %v3519_v28 = vld [vmem:[#allocation2 + $0x2f8] sm:$0xf0] }
  0x9d   :  { %1679 = vmatpush.bf16.msra.mxu2 %v3726_v29  ;;  %v3790_v29 = vor.u32 %v4838_v13, %v3789_v12  ;;  %v3522_v36 = vor.u32 %v4768_v27, %v3519_v28  ;;  %v3199_v12 = vld [vmem:[#allocation2 + $0x78] sm:$0xf0]  ;;  %v4720_v13 = vld [vmem:[#allocation2 + $0x16c] sm:$0xf]  ;;  %v3458_v27 = vor.u32 %v4752_v15, %v3455_v16 }
  0x9e   :  { %1692 = vmatpush.bf16.msra.mxu3 %v3854_v33  ;;  %v4013_v33 = vld [vmem:[#allocation2 + $0x6c8] sm:$0xf]  ;;  %v3330_v23 = vor.u32 %v4720_v13, %v3327_v14  ;;  %v3183_v28 = vld [vmem:[#allocation2 + $0x58] sm:$0xf0] }
  0x9f   :  { %1654 = vmatpush.bf16.msra.mxu0 %v3454_v42  ;;  %v3375_v42 = vld [vmem:[#allocation2 + $0x1d8] sm:$0xf0]  ;;  %v4014_v45 = vor.u32 %v4894_v34, %v4013_v33 }
  0xa0   :  { %1667 = vmatpush.bf16.msra.mxu1 %v3582_v43  ;;  %v4764_v43 = vld [vmem:[#allocation2 + $0x2cc] sm:$0xf]  ;;  %v3378_v47 = vor.u32 %v4732_v39, %v3375_v42  ;;  %v4874_v39 = vld [vmem:[#allocation2 + $0x634] sm:$0xf0] }
  0xa1   :  { %1680 = vmatpush.bf16.msra.mxu2 %v3710_v44  ;;  %v3503_v44 = vld [vmem:[#allocation2 + $0x2d8] sm:$0xf0]  ;;  %v4680_v42 = vld [vmem:[#allocation2 + $0x2c] sm:$0xf]  ;;  %v3934_v50 = vor.u32 %v4874_v39, %v3933_v38 }
  0xa2   :  { %1693 = vmatpush.bf16.msra.mxu3 %v3838_v48  ;;  %v3997_v48 = vld [vmem:[#allocation2 + $0x6a8] sm:$0xf]  ;;  %v3506_v51 = vor.u32 %v4764_v43, %v3503_v44  ;;  %v3615_v38 = vld [vmem:[#allocation2 + $0x3b8] sm:$0xf0]  ;;  %v4824_v39 = vld [vmem:[#allocation2 + $0x4ac] sm:$0xf] }
  0xa3   :  { %1655 = vmatpush.bf16.msra.mxu0 %v3438_v54  ;;  %v3359_v54 = vld [vmem:[#allocation2 + $0x1b8] sm:$0xf0]  ;;  %v3998_v57 = vor.u32 %v4890_v49, %v3997_v48  ;;  %v4744_v48 = vld [vmem:[#allocation2 + $0x22c] sm:$0xf] }
  0xa4   :  { %1668 = vmatpush.bf16.msra.mxu1 %v3566_v55  ;;  %v4760_v55 = vld [vmem:[#allocation2 + $0x2ac] sm:$0xf]  ;;  %v3362_v59 = vor.u32 %v4728_v53, %v3359_v54  ;;  %v3423_v49 = vld [vmem:[#allocation2 + $0x238] sm:$0xf0] }
  0xa5   :  { %1681 = vmatpush.bf16.msra.mxu2 %v3694_v56  ;;  %v3487_v56 = vld [vmem:[#allocation2 + $0x2b8] sm:$0xf0] }
  0xa6   :  { %1694 = vmatpush.bf16.msra.mxu3 %v3822_v60  ;;  %v3981_v60 = vld [vmem:[#allocation2 + $0x688] sm:$0xf]  ;;  %v3490_v63 = vor.u32 %v4760_v55, %v3487_v56  ;;  %v4676_v55 = vld [vmem:[#allocation2 + $0xc] sm:$0xf]  ;;  %v3151_v56 = vld [vmem:[#allocation2 + $0x18] sm:$0xf0] }
  0xa7   :  { %1656 = vmatpush.bf16.msra.mxu0 %v3422_v2  ;;  %v3343_v2 = vld [vmem:[#allocation2 + $0x198] sm:$0xf0] }
  0xa8   :  { %1669 = vmatpush.bf16.msra.mxu1 %v3550_v5  ;;  %v3982_v5 = vor.u32 %v4886_v61, %v3981_v60  ;;  %v3346_v7 = vor.u32 %v4724_v1, %v3343_v2  ;;  %v3279_v60 = vld [vmem:[#allocation2 + $0x118] sm:$0xf0]  ;;  %v4740_v61 = vld [vmem:[#allocation2 + $0x20c] sm:$0xf] }
  0xa9   :  { %1682 = vmatpush.bf16.msra.mxu2 %v3678_v6  ;;  %v3218_v6 = vor.u32 %v4692_v62, %v3215_v0  ;;  %v3407_v62 = vld [vmem:[#allocation2 + $0x218] sm:$0xf0]  ;;  %v4800_v0 = vld [vmem:[#allocation2 + $0x3ec] sm:$0xf] }
  0xaa   :  { %1695 = vmatpush.bf16.msra.mxu3 %v3806_v10  ;;  %v4688_v10 = vld [vmem:[#allocation2 + $0x6c] sm:$0xf]  ;;  %v3647_v1 = vld [vmem:[#allocation2 + $0x3f8] sm:$0xf0]  ;;  %v3410_v13 = vor.u32 %v4740_v61, %v3407_v62 }
  0xab   :  { %1657 = vmatpush.bf16.msra.mxu0 %v3406_v17  ;;  %v3966_v17 = vor.u32 %v4882_v9, %v3965_v8  ;;  %v3202_v21 = vor.u32 %v4688_v10, %v3199_v12  ;;  %v4832_v2 = vld [vmem:[#allocation2 + $0x4ec] sm:$0xf]  ;;  %v3154_v8 = vor.u32 %v4676_v55, %v3151_v56  ;;  %v3650_v14 = vor.u32 %v4800_v0, %v3647_v1  ;;  %v3727_v56 = vld [vmem:[#allocation2 + $0x498] sm:$0xf0] }
  0xac   :  { %1670 = vmatpush.bf16.msra.mxu1 %v3534_v25  ;;  %v4878_v25 = vld [vmem:[#allocation2 + $0x654] sm:$0xf0]  ;;  %v4896_v10 = vld [vmem:[#allocation2 + $0x6ec] sm:$0xf]  ;;  %v3778_v15 = vor.u32 %v4832_v2, %v3775_v4  ;;  %v3583_v2 = vld [vmem:[#allocation2 + $0x378] sm:$0xf0] }
  0xad   :  { %1683 = vmatpush.bf16.msra.mxu2 %v3662_v26  ;;  %v4684_v26 = vld [vmem:[#allocation2 + $0x4c] sm:$0xf]  ;;  %v3950_v33 = vor.u32 %v4878_v25, %v3949_v24  ;;  %v3759_v25 = vld [vmem:[#allocation2 + $0x4d8] sm:$0xf0] }
  0xae   :  { %1696 = vmatpush.bf16.msra.mxu3 %v3790_v29  ;;  %1658 = vmatmul.bf16.vlgmr.msra.gmra.mxu0 %v5201_v18  ;;  %v4716_v29 = vld [vmem:[#allocation2 + $0x14c] sm:$0xf]  ;;  %v3186_v35 = vor.u32 %v4684_v26, %v3183_v28 }
  0xaf   :  { %1702 = vmatpush.bf16.msrb.mxu0 %v4030_v30  ;;  %1671 = vmatmul.bf16.vlgmr.msra.gmra.mxu1 %v5205_v20  ;;  %v3311_v30 = vld [vmem:[#allocation2 + $0x158] sm:$0xf0]  ;;  %v4860_v26 = vld [vmem:[#allocation2 + $0x5cc] sm:$0xf] }
  0xb0   :  { %1715 = vmatpush.bf16.msrb.mxu1 %v3266_v31  ;;  %1684 = vmatmul.bf16.vlgmr.msra.gmra.mxu2 %v5221_v40  ;;  %v4748_v31 = vld [vmem:[#allocation2 + $0x24c] sm:$0xf] }
  0xb1   :  { %1728 = vmatpush.bf16.msrb.mxu2 %v3394_v32  ;;  %1697 = vmatmul.bf16.vlgmr.msra.gmra.mxu3 %v5223_v41  ;;  %v3439_v32 = vld [vmem:[#allocation2 + $0x258] sm:$0xf0]  ;;  %v4892_v28 = vld [vmem:[#allocation2 + $0x6cc] sm:$0xf] }
  0xb2   :  { %1741 = vmatpush.bf16.msrb.mxu3 %v3522_v36  ;;  %v3314_v36 = vor.u32 %v4716_v29, %v3311_v30  ;;  %v3442_v44 = vor.u32 %v4748_v31, %v3439_v32  ;;  %v4015_v29 = vld [vmem:[#allocation2 + $0x6d8] sm:$0xf0]  ;;  %v4784_v1 = vld [vmem:[#allocation2 + $0x36c] sm:$0xf] }
  0xb3   :  { %1703 = vmatpush.bf16.msrb.mxu0 %v4014_v45  ;;  %v3167_v45 = vld [vmem:[#allocation2 + $0x38] sm:$0xf0] }
  0xb4   :  { %1716 = vmatpush.bf16.msrb.mxu1 %v3250_v46  ;;  %v4712_v46 = vld [vmem:[#allocation2 + $0x12c] sm:$0xf]  ;;  %v3170_v53 = vor.u32 %v4680_v42, %v3167_v45  ;;  %v4018_v42 = vor.u32 %v4892_v28, %v4015_v29  ;;  %v5264_v28 = vld [vmem:[%s5463_s2] sm:$0xf] }
  0xb5   :  { %1729 = vmatpush.bf16.msrb.mxu2 %v3378_v47  ;;  %v3295_v47 = vld [vmem:[#allocation2 + $0x138] sm:$0xf0]  ;;  %v4856_v45 = vld [vmem:[#allocation2 + $0x5ac] sm:$0xf] }
  0xb6   :  { %1742 = vmatpush.bf16.msrb.mxu3 %v3506_v51  ;;  %v3917_v51 = vld [vmem:[#allocation2 + $0x608] sm:$0xf]  ;;  %v3298_v54 = vor.u32 %v4712_v46, %v3295_v47  ;;  %v3871_v46 = vld [vmem:[#allocation2 + $0x5b8] sm:$0xf0]  ;;  %v4888_v47 = vld [vmem:[#allocation2 + $0x6ac] sm:$0xf] }
  0xb7   :  { %1704 = vmatpush.bf16.msrb.mxu0 %v3998_v57  ;;  %v5241_v34 = vpop.f32.mrf.mxu0  ;;  %v4708_v57 = vld [vmem:[#allocation2 + $0x10c] sm:$0xf]  ;;  %v3918_v3 = vor.u32 %v4870_v52, %v3917_v51  ;;  %v3874_v51 = vor.u32 %v4856_v45, %v3871_v46  ;;  %v3807_v45 = vld [vmem:[#allocation2 + $0x538] sm:$0xf0] }
  0xb8   :  { %1717 = vmatpush.bf16.msrb.mxu1 %v3234_v58  ;;  %v5243_v43 = vpop.f32.mrf.mxu1  ;;  %v5245_v58 = vpop.f32.mrf.mxu2  ;;  %v3282_v9 = vor.u32 %v4708_v57, %v3279_v60  ;;  %v4788_v52 = vld [vmem:[#allocation2 + $0x38c] sm:$0xf]  ;;  %v3983_v60 = vld [vmem:[#allocation2 + $0x698] sm:$0xf0] }
  0xb9   :  { %1730 = vmatpush.bf16.msrb.mxu2 %v3362_v59  ;;  %v3426_v59 = vor.u32 %v4744_v48, %v3423_v49  ;;  %v3999_v48 = vld [vmem:[#allocation2 + $0x6b8] sm:$0xf0]  ;;  %v4852_v57 = vld [vmem:[#allocation2 + $0x58c] sm:$0xf] }
  0xba   :  { %1743 = vmatpush.bf16.msrb.mxu3 %v3490_v63  ;;  %v5247_v63 = vpop.f32.mrf.mxu3  ;;  %v4002_v55 = vor.u32 %v4888_v47, %v3999_v48  ;;  %v4872_v46 = vld [vmem:[#allocation2 + $0x62c] sm:$0xf]  ;;  %v3935_v47 = vld [vmem:[#allocation2 + $0x638] sm:$0xf0]  ;;  %v289_v48 = vperm.slane %v5264_v28, 0 }
  0xbb   :  { %1705 = vmatpush.bf16.msrb.mxu0 %v3982_v5  ;;  %v4864_v5 = vld [vmem:[#allocation2 + $0x5ec] sm:$0xf] }
  0xbc   :  { %1718 = vmatpush.bf16.msrb.mxu1 %v3218_v6  ;;  %v3903_v6 = vld [vmem:[#allocation2 + $0x5f8] sm:$0xf0] }
  0xbd   :  { %1731 = vmatpush.bf16.msrb.mxu2 %v3346_v7  ;;  %v3906_v16 = vor.u32 %v4864_v5, %v3903_v6  ;;  %v3711_v5 = vld [vmem:[#allocation2 + $0x478] sm:$0xf0]  ;;  %v4848_v6 = vld [vmem:[#allocation2 + $0x56c] sm:$0xf] }
  0xbe   :  { %1744 = vmatpush.bf16.msrb.mxu3 %v3474_v11  ;;  %v4031_v11 = vld [vmem:[#allocation2 + $0x6f8] sm:$0xf0] }
  0xbf   :  { %1706 = vmatpush.bf16.msrb.mxu0 %v3966_v17  ;;  %v1453_v7 = vpop.f32.mrf.mxu0  ;;  %v4796_v17 = vld [vmem:[#allocation2 + $0x3cc] sm:$0xf]  ;;  %v4034_v24 = vor.u32 %v4896_v10, %v4031_v11  ;;  %v3586_v10 = vor.u32 %v4784_v1, %v3583_v2 }
  0xc0   :  { %1719 = vmatpush.bf16.msrb.mxu1 %v3202_v21  ;;  %v1466_v12 = vpop.f32.mrf.mxu1  ;;  %v3631_v21 = vld [vmem:[#allocation2 + $0x3d8] sm:$0xf0]  ;;  %v1479_v30 = vpop.f32.mrf.mxu2 }
  0xc1   :  { %1732 = vmatpush.bf16.msrb.mxu2 %v3330_v23  ;;  %v4828_v23 = vld [vmem:[#allocation2 + $0x4cc] sm:$0xf]  ;;  %v3634_v31 = vor.u32 %v4796_v17, %v3631_v21  ;;  %v3839_v7 = vld [vmem:[#allocation2 + $0x578] sm:$0xf0] }
  0xc2   :  { %1745 = vmatpush.bf16.msrb.mxu3 %v3458_v27  ;;  %v3887_v27 = vld [vmem:[#allocation2 + $0x5d8] sm:$0xf0]  ;;  %v1492_v32 = vpop.f32.mrf.mxu3  ;;  %v3842_v12 = vor.u32 %v4848_v6, %v3839_v7 }
  0xc3   :  { %1707 = vmatpush.bf16.msrb.mxu0 %v3950_v33  ;;  %v3762_v33 = vor.u32 %v4828_v23, %v3759_v25  ;;  %v3695_v21 = vld [vmem:[#allocation2 + $0x458] sm:$0xf0]  ;;  %v4844_v23 = vld [vmem:[#allocation2 + $0x54c] sm:$0xf] }
  0xc4   :  { %1720 = vmatpush.bf16.msrb.mxu1 %v3186_v35  ;;  %v3890_v35 = vor.u32 %v4860_v26, %v3887_v27  ;;  %v4876_v25 = vld [vmem:[#allocation2 + $0x64c] sm:$0xf]  ;;  %v3951_v26 = vld [vmem:[#allocation2 + $0x658] sm:$0xf0] }
  0xc5   :  { %1733 = vmatpush.bf16.msrb.mxu2 %v3314_v36  ;;  %v4792_v36 = vld [vmem:[#allocation2 + $0x3ac] sm:$0xf] }
  0xc6   :  { %1746 = vmatpush.bf16.msrb.mxu3 %v3442_v44  ;;  %v3743_v44 = vld [vmem:[#allocation2 + $0x4b8] sm:$0xf0]  ;;  %v3618_v49 = vor.u32 %v4792_v36, %v3615_v38  ;;  %v4808_v38 = vld [vmem:[#allocation2 + $0x42c] sm:$0xf] }
  0xc7   :  { %1708 = vmatpush.bf16.msrb.mxu0 %v3934_v50  ;;  %v3746_v50 = vor.u32 %v4824_v39, %v3743_v44  ;;  %v3551_v36 = vld [vmem:[#allocation2 + $0x338] sm:$0xf0]  ;;  %v3954_v39 = vor.u32 %v4876_v25, %v3951_v26  ;;  %v4840_v44 = vld [vmem:[#allocation2 + $0x52c] sm:$0xf]  ;;  %v4953_v25 = vld [vmem:[#allocation5 + $0x1ac] sm:$0xf0] }
  0xc8   :  { %1721 = vmatpush.bf16.msrb.mxu1 %v3170_v53  ;;  %v3599_v53 = vld [vmem:[#allocation2 + $0x398] sm:$0xf0] }
  0xc9   :  { %1734 = vmatpush.bf16.msrb.mxu2 %v3298_v54  ;;  %v4820_v54 = vld [vmem:[#allocation2 + $0x48c] sm:$0xf] }
  0xca   :  { %1747 = vmatpush.bf16.msrb.mxu3 %v3426_v59  ;;  %v4884_v59 = vld [vmem:[#allocation2 + $0x68c] sm:$0xf] }
  0xcb   :  { %1709 = vmatpush.bf16.msrb.mxu0 %v3918_v3  ;;  %v5253_v61 = vpop.f32.mrf.mxu0  ;;  %v4816_v3 = vld [vmem:[#allocation2 + $0x46c] sm:$0xf]  ;;  %v3986_v4 = vor.u32 %v4884_v59, %v3983_v60  ;;  %v3791_v59 = vld [vmem:[#allocation2 + $0x518] sm:$0xf0] }
  0xcc   :  { %1722 = vmatpush.bf16.msrb.mxu1 %v3154_v8  ;;  %v5255_v62 = vpop.f32.mrf.mxu1  ;;  %v4880_v8 = vld [vmem:[#allocation2 + $0x66c] sm:$0xf]  ;;  %v3714_v11 = vor.u32 %v4816_v3, %v3711_v5  ;;  %v4277_v3 = vld [vmem:[#allocation5 + $0x1e0] sm:$0xf] }
  0xcd   :  { %1735 = vmatpush.bf16.msrb.mxu2 %v3282_v9  ;;  %v3967_v9 = vld [vmem:[#allocation2 + $0x678] sm:$0xf0]  ;;  %v4868_v60 = vld [vmem:[#allocation2 + $0x60c] sm:$0xf] }
  0xce   :  { %1748 = vmatpush.bf16.msrb.mxu3 %v3410_v13  ;;  %1710 = vmatmul.bf16.vlgmr.msrb.gmra.mxu0 %v5219_v37  ;;  %v4780_v13 = vld [vmem:[#allocation2 + $0x34c] sm:$0xf]  ;;  %v3970_v17 = vor.u32 %v4880_v8, %v3967_v9  ;;  %v1452_v9 = vadd.f32 %v5241_v34, %v289_v48  ;;  %v4245_v34 = vld [vmem:[#allocation5 + $0x1a0] sm:$0xf] }
  0xcf   :  { %1754 = vmatpush.bf16.msra.mxu0 %v3650_v14  ;;  %1723 = vmatmul.bf16.vlgmr.msrb.gmra.mxu1 %v5203_v19  ;;  %v3730_v19 = vor.u32 %v4820_v54, %v3727_v56  ;;  %v3567_v14 = vld [vmem:[#allocation2 + $0x358] sm:$0xf0]  ;;  %v4804_v54 = vld [vmem:[#allocation2 + $0x40c] sm:$0xf] }
  0xd0   :  { %1767 = vmatpush.bf16.msra.mxu1 %v3778_v15  ;;  %1736 = vmatmul.bf16.vlgmr.msrb.gmra.mxu2 %v5207_v22  ;;  %v3855_v22 = vld [vmem:[#allocation2 + $0x598] sm:$0xf0]  ;;  %v4812_v15 = vld [vmem:[#allocation2 + $0x44c] sm:$0xf]  ;;  %v3570_v29 = vor.u32 %v4780_v13, %v3567_v14  ;;  %v4261_v13 = vld [vmem:[#allocation5 + $0x1c0] sm:$0xf] }
  0xd1   :  { %1780 = vmatpush.bf16.msra.mxu2 %v3906_v16  ;;  %1749 = vmatmul.bf16.vlgmr.msrb.gmra.mxu3 %v5201_v18  ;;  %v3602_v18 = vor.u32 %v4788_v52, %v3599_v53  ;;  %v3858_v0 = vor.u32 %v4852_v57, %v3855_v22  ;;  %v3698_v32 = vor.u32 %v4812_v15, %v3695_v21  ;;  %v3535_v53 = vld [vmem:[#allocation2 + $0x318] sm:$0xf0]  ;;  %v4836_v22 = vld [vmem:[#allocation2 + $0x50c] sm:$0xf]  ;;  %v4957_v14 = vld [vmem:[#allocation5 + $0x1cc] sm:$0xf0] }
  0xd2   :  { %1793 = vmatpush.bf16.msra.mxu3 %v4034_v24  ;;  %v3823_v24 = vld [vmem:[#allocation2 + $0x558] sm:$0xf0]  ;;  %v3810_v52 = vor.u32 %v4840_v44, %v3807_v45  ;;  %v3938_v57 = vor.u32 %v4872_v46, %v3935_v47  ;;  %v3794_v6 = vor.u32 %v4836_v22, %v3791_v59  ;;  %v4262_v21 = vor.u32 %v4957_v14, %v4261_v13  ;;  %v4069_v44 = vld [vmem:[#allocation5 + $0x40] sm:$0xf]  ;;  %v4909_v47 = vld [vmem:[#allocation5 + $0x4c] sm:$0xf0] }
  0xd3   :  { %1755 = vmatpush.bf16.msra.mxu0 %v3634_v31  ;;  %v5257_v16 = vpop.f32.mrf.mxu2  ;;  %v1505_v30 = vpop.f32.mrf.mxu0  ;;  %v4905_v59 = vld [vmem:[#allocation5 + $0x2c] sm:$0xf0]  ;;  %v4927_v13 = vld [vmem:[#allocation5 + $0xe4] sm:$0xf]  ;;  %v4151_v14 = vld [vmem:[#allocation5 + $0xf0] sm:$0xf0] }
  0xd4   :  { %1768 = vmatpush.bf16.msra.mxu1 %v3762_v33  ;;  %v5259_v27 = vpop.f32.mrf.mxu3  ;;  %v1518_v31 = vpop.f32.mrf.mxu1  ;;  %v3826_v33 = vor.u32 %v4844_v23, %v3823_v24  ;;  %v4117_v23 = vld [vmem:[#allocation5 + $0xa0] sm:$0xf]  ;;  %v4921_v24 = vld [vmem:[#allocation5 + $0xac] sm:$0xf0] }
  0xd5   :  { %1781 = vmatpush.bf16.msra.mxu2 %v3890_v35  ;;  %v4776_v35 = vld [vmem:[#allocation2 + $0x32c] sm:$0xf]  ;;  %v4118_v26 = vor.u32 %v4921_v24, %v4117_v23  ;;  %v4101_v30 = vld [vmem:[#allocation5 + $0x80] sm:$0xf]  ;;  %v4917_v31 = vld [vmem:[#allocation5 + $0x8c] sm:$0xf0] }
  0xd6   :  { %1794 = vmatpush.bf16.msra.mxu3 %v4018_v42  ;;  %v3679_v42 = vld [vmem:[#allocation2 + $0x438] sm:$0xf0] }
  0xd7   :  { %1756 = vmatpush.bf16.msra.mxu0 %v3618_v49  ;;  %v3554_v49 = vor.u32 %v4776_v35, %v3551_v36  ;;  %v4085_v36 = vld [vmem:[#allocation5 + $0x60] sm:$0xf] }
  0xd8   :  { %1769 = vmatpush.bf16.msra.mxu1 %v3746_v50  ;;  %v4772_v50 = vld [vmem:[#allocation2 + $0x30c] sm:$0xf] }
  0xd9   :  { %1782 = vmatpush.bf16.msra.mxu2 %v3874_v51  ;;  %v3682_v51 = vor.u32 %v4808_v38, %v3679_v42  ;;  %v3538_v2 = vor.u32 %v4772_v50, %v3535_v53  ;;  %v4913_v38 = vld [vmem:[#allocation5 + $0x6c] sm:$0xf0]  ;;  %v4197_v50 = vld [vmem:[#allocation5 + $0x140] sm:$0xf] }
  0xda   :  { %1795 = vmatpush.bf16.msra.mxu3 %v4002_v55  ;;  %v3663_v55 = vld [vmem:[#allocation2 + $0x418] sm:$0xf0]  ;;  %v4945_v42 = vld [vmem:[#allocation5 + $0x16c] sm:$0xf0] }
  0xdb   :  { %1757 = vmatpush.bf16.msra.mxu0 %v3602_v18  ;;  %v1531_v56 = vpop.f32.mrf.mxu2  ;;  %v3919_v18 = vld [vmem:[#allocation2 + $0x618] sm:$0xf0]  ;;  %v3666_v5 = vor.u32 %v4804_v54, %v3663_v55  ;;  %v290_v54 = vperm.slane %v5264_v28, 1  ;;  %v4070_v55 = vor.u32 %v4909_v47, %v4069_v44 }
  0xdc   :  { %1770 = vmatpush.bf16.msra.mxu1 %v3730_v19  ;;  %v4149_v19 = vld [vmem:[#allocation5 + $0xe0] sm:$0xf]  ;;  %v1544_v1 = vpop.f32.mrf.mxu3  ;;  %v3922_v7 = vor.u32 %v4868_v60, %v3919_v18 }
  0xdd   :  { %1783 = vmatpush.bf16.msra.mxu2 %v3858_v0  ;;  %v4929_v0 = vld [vmem:[#allocation5 + $0xec] sm:$0xf0]  ;;  %v4053_v56 = vld [vmem:[#allocation5 + $0x20] sm:$0xf] }
  0xde   :  { %1796 = vmatpush.bf16.msra.mxu3 %v3986_v4  ;;  %v4961_v4 = vld [vmem:[#allocation5 + $0x1ec] sm:$0xf0]  ;;  %v4150_v8 = vor.u32 %v4929_v0, %v4149_v19  ;;  %v4389_v18 = vld [vmem:[#allocation5 + $0x2c0] sm:$0xf] }
  0xdf   :  { %1758 = vmatpush.bf16.msra.mxu0 %v3586_v10  ;;  %v4278_v10 = vor.u32 %v4961_v4, %v4277_v3  ;;  %v4989_v19 = vld [vmem:[#allocation5 + $0x2cc] sm:$0xf0]  ;;  %v4181_v0 = vld [vmem:[#allocation5 + $0x120] sm:$0xf]  ;;  %v1543_v3 = vadd.f32 %v5259_v27, %v290_v54  ;;  %v4054_v4 = vor.u32 %v4905_v59, %v4053_v56  ;;  %v4279_v27 = vld [vmem:[#allocation5 + $0x1f0] sm:$0xf0] }
  0xe0   :  { %1771 = vmatpush.bf16.msra.mxu1 %v3714_v11  ;;  %v4133_v11 = vld [vmem:[#allocation5 + $0xc0] sm:$0xf]  ;;  %v4937_v1 = vld [vmem:[#allocation5 + $0x12c] sm:$0xf0]  ;;  %v4231_v56 = vld [vmem:[#allocation5 + $0x190] sm:$0xf0] }
  0xe1   :  { %1784 = vmatpush.bf16.msra.mxu2 %v3842_v12  ;;  %v4925_v12 = vld [vmem:[#allocation5 + $0xcc] sm:$0xf0]  ;;  %v4309_v59 = vld [vmem:[#allocation5 + $0x220] sm:$0xf] }
  0xe2   :  { %1797 = vmatpush.bf16.msra.mxu3 %v3970_v17  ;;  %v4134_v15 = vor.u32 %v4925_v12, %v4133_v11  ;;  %v1465_v17 = vadd.f32 %v5243_v43, %v1452_v9  ;;  %v4246_v43 = vor.u32 %v4953_v25, %v4245_v34  ;;  %v4985_v11 = vld [vmem:[#allocation5 + $0x2ac] sm:$0xf0]  ;;  %v4154_v25 = vor.u32 %v4927_v13, %v4151_v14  ;;  %v4407_v13 = vld [vmem:[#allocation5 + $0x2f0] sm:$0xf0]  ;;  %v4939_v14 = vld [vmem:[#allocation5 + $0x144] sm:$0xf] }
  0xe3   :  { %1759 = vmatpush.bf16.msra.mxu0 %v3570_v29  ;;  %v4933_v12 = vld [vmem:[#allocation5 + $0x10c] sm:$0xf0] }
  0xe4   :  { %1772 = vmatpush.bf16.msra.mxu1 %v3698_v32  ;;  %v1478_v29 = vadd.f32 %v5245_v58, %v1465_v17  ;;  %v4949_v32 = vld [vmem:[#allocation5 + $0x18c] sm:$0xf0]  ;;  %v4086_v58 = vor.u32 %v4913_v38, %v4085_v36  ;;  %v4341_v36 = vld [vmem:[#allocation5 + $0x260] sm:$0xf] }
  0xe5   :  { %1785 = vmatpush.bf16.msra.mxu2 %v3826_v33  ;;  %v4102_v33 = vor.u32 %v4917_v31, %v4101_v30  ;;  %v4923_v30 = vld [vmem:[#allocation5 + $0xc4] sm:$0xf]  ;;  %v4135_v31 = vld [vmem:[#allocation5 + $0xd0] sm:$0xf0]  ;;  %v4977_v38 = vld [vmem:[#allocation5 + $0x26c] sm:$0xf0] }
  0xe6   :  { %1798 = vmatpush.bf16.msra.mxu3 %v3954_v39  ;;  %v4213_v39 = vld [vmem:[#allocation5 + $0x160] sm:$0xf]  ;;  %v4342_v44 = vor.u32 %v4977_v38, %v4341_v36  ;;  %v4931_v36 = vld [vmem:[#allocation5 + $0x104] sm:$0xf]  ;;  %v4167_v38 = vld [vmem:[#allocation5 + $0x110] sm:$0xf0] }
  0xe7   :  { %1760 = vmatpush.bf16.msra.mxu0 %v3554_v49  ;;  %v4214_v46 = vor.u32 %v4945_v42, %v4213_v39  ;;  %v4405_v49 = vld [vmem:[#allocation5 + $0x2e0] sm:$0xf]  ;;  %v4919_v42 = vld [vmem:[#allocation5 + $0xa4] sm:$0xf] }
  0xe8   :  { %1773 = vmatpush.bf16.msra.mxu1 %v3682_v51  ;;  %v4941_v51 = vld [vmem:[#allocation5 + $0x14c] sm:$0xf0] }
  0xe9   :  { %1786 = vmatpush.bf16.msra.mxu2 %v3810_v52  ;;  %v4198_v22 = vor.u32 %v4941_v51, %v4197_v50  ;;  %v4915_v51 = vld [vmem:[#allocation5 + $0x84] sm:$0xf] }
  0xea   :  { %1799 = vmatpush.bf16.msra.mxu3 %v3938_v57 }
  0xeb   :  { %1761 = vmatpush.bf16.msra.mxu0 %v3538_v2  ;;  %v1555_v35 = vpop.f32.mrf.mxu0  ;;  %v4390_v2 = vor.u32 %v4989_v19, %v4389_v18 }
  0xec   :  { %1774 = vmatpush.bf16.msra.mxu1 %v3666_v5  ;;  %v4037_v5 = vld [vmem:[#allocation5] sm:$0xf]  ;;  %v1556_v23 = vadd.f32 %v1555_v35, %v1543_v3  ;;  %v4943_v3 = vld [vmem:[#allocation5 + $0x164] sm:$0xf] }
  0xed   :  { %1787 = vmatpush.bf16.msra.mxu2 %v3794_v6  ;;  %v4901_v6 = vld [vmem:[#allocation5 + $0xc] sm:$0xf0] }
  0xee   :  { %1800 = vmatpush.bf16.msra.mxu3 %v3922_v7  ;;  %1762 = vmatmul.bf16.vlgmr.msra.gmra.mxu0 %v5205_v20  ;;  %v4229_v20 = vld [vmem:[#allocation5 + $0x180] sm:$0xf]  ;;  %v4038_v24 = vor.u32 %v4901_v6, %v4037_v5  ;;  %v4907_v6 = vld [vmem:[#allocation5 + $0x44] sm:$0xf] }
  0xef   :  { %2592 = vmatpush.bf16.msrb.mxu0 %v4150_v8  ;;  %1775 = vmatmul.bf16.vlgmr.msra.gmra.mxu1 %v5221_v40  ;;  %v1491_v40 = vadd.f32 %v5247_v63, %v1478_v29  ;;  %v4993_v63 = vld [vmem:[#allocation5 + $0x2ec] sm:$0xf0]  ;;  %v4165_v8 = vld [vmem:[#allocation5 + $0x100] sm:$0xf] }
  0xf0   :  { %2605 = vmatpush.bf16.msrb.mxu1 %v4278_v10  ;;  %1788 = vmatmul.bf16.vlgmr.msra.gmra.mxu2 %v5223_v41  ;;  %v4230_v41 = vor.u32 %v4949_v32, %v4229_v20  ;;  %v4406_v53 = vor.u32 %v4993_v63, %v4405_v49  ;;  %v4373_v10 = vld [vmem:[#allocation5 + $0x2a0] sm:$0xf]  ;;  %v4981_v29 = vld [vmem:[#allocation5 + $0x28c] sm:$0xf0]  ;;  %v4955_v32 = vld [vmem:[#allocation5 + $0x1c4] sm:$0xf] }
  0xf1   :  { %1801 = vmatmul.bf16.vlgmr.msra.gmra.mxu3 %v5219_v37  ;;  %v5275_v37 = vpop.f32.mrf.mxu1  ;;  %v1504_v45 = vadd.f32 %v5253_v61, %v1491_v40  ;;  %v4374_v17 = vor.u32 %v4985_v11, %v4373_v10  ;;  %v4325_v49 = vld [vmem:[#allocation5 + $0x240] sm:$0xf]  ;;  %v4973_v63 = vld [vmem:[#allocation5 + $0x24c] sm:$0xf0] }
  0xf2   :  { %2618 = vmatpush.bf16.msrb.mxu2 %v4406_v53  ;;  %v1569_v40 = vadd.f32 %v5275_v37, %v1556_v23  ;;  %v4103_v53 = vld [vmem:[#allocation5 + $0x90] sm:$0xf0]  ;;  %v4326_v54 = vor.u32 %v4973_v63, %v4325_v49  ;;  %v4285_v49 = vld [vmem:[#allocation5 + $0x1e8] sm:$0xf]  ;;  %v4962_v63 = vld [vmem:[#allocation5 + $0x1f4] sm:$0xf0] }
  0xf3   :  { %2593 = vmatpush.bf16.msrb.mxu0 %v4134_v15  ;;  %v5278_v48 = vpop.f32.mrf.mxu2  ;;  %v1557_v57 = vpop.f32.mrf.mxu0  ;;  %v1517_v61 = vadd.f32 %v5255_v62, %v1504_v45  ;;  %v4182_v62 = vor.u32 %v4937_v1, %v4181_v0  ;;  %v4951_v45 = vld [vmem:[#allocation5 + $0x1a4] sm:$0xf]  ;;  %v4087_v1 = vld [vmem:[#allocation5 + $0x70] sm:$0xf0] }
  0xf4   :  { %2606 = vmatpush.bf16.msrb.mxu1 %v4262_v21  ;;  %v5280_v52 = vpop.f32.mrf.mxu3  ;;  %v4959_v21 = vld [vmem:[#allocation5 + $0x1e4] sm:$0xf]  ;;  %v1582_v37 = vadd.f32 %v5278_v48, %v1569_v40  ;;  %v4969_v48 = vld [vmem:[#allocation5 + $0x22c] sm:$0xf0] }
  0xf5   :  { %v1530_v7 = vadd.f32 %v5257_v16, %v1517_v61  ;;  %v4166_v16 = vor.u32 %v4933_v12, %v4165_v8  ;;  %v4911_v0 = vld [vmem:[#allocation5 + $0x64] sm:$0xf]  ;;  %v4965_v8 = vld [vmem:[#allocation5 + $0x20c] sm:$0xf0] }
  0xf6   :  { %2619 = vmatpush.bf16.msrb.mxu2 %v4390_v2  ;;  %v1595_v57 = vadd.f32 %v5280_v52, %v1582_v37  ;;  %v4310_v2 = vor.u32 %v4969_v48, %v4309_v59  ;;  %v4090_v52 = vor.u32 %v4911_v0, %v4087_v1  ;;  %v4991_v12 = vld [vmem:[#allocation5 + $0x2e4] sm:$0xf]  ;;  %v4286_v59 = vor.u32 %v4962_v63, %v4285_v49  ;;  %v4926_v48 = vld [vmem:[#allocation5 + $0xd4] sm:$0xf0]  ;;  %v4269_v0 = vld [vmem:[#allocation5 + $0x1c8] sm:$0xf] }
  0xf7   :  { %2594 = vmatpush.bf16.msrb.mxu0 %v4118_v26  ;;  %v1806_v34 = vmax.f32 %v1530_v7, 0.0  ;;  %v4357_v26 = vld [vmem:[#allocation5 + $0x280] sm:$0xf]  ;;  %v4071_v7 = vld [vmem:[#allocation5 + $0x50] sm:$0xf0] }
  0xf8   :  { %2607 = vmatpush.bf16.msrb.mxu1 %v4246_v43  ;;  %v4282_v43 = vor.u32 %v4959_v21, %v4279_v27  ;;  %v4358_v20 = vor.u32 %v4981_v29, %v4357_v26  ;;  %v4074_v23 = vor.u32 %v4907_v6, %v4071_v7  ;;  %v4055_v26 = vld [vmem:[#allocation5 + $0x30] sm:$0xf0]  ;;  %v4958_v1 = vld [vmem:[#allocation5 + $0x1d4] sm:$0xf0]  ;;  %v5017_v6 = vld [vmem:[#allocation5 + $0x3ac] sm:$0xf0] }
  0xf9   :  { %v1570_v60 = vpop.f32.mrf.mxu1  ;;  %v5287_v35 = vpack.c.bf16 %v1806_v34, %v1806_v34  ;;  %v4922_v7 = vld [vmem:[#allocation5 + $0xb4] sm:$0xf0]  ;;  %v4453_v49 = vld [vmem:[#allocation5 + $0x340] sm:$0xf]  ;;  %v5005_v63 = vld [vmem:[#allocation5 + $0x34c] sm:$0xf0] }
  0xfa   :  { %2620 = vmatpush.bf16.msrb.mxu2 %v4374_v17  ;;  %v4410_v17 = vor.u32 %v4991_v12, %v4407_v13 }
  0xfb   :  { %2595 = vmatpush.bf16.msrb.mxu0 %v4102_v33  ;;  %v1583_v9 = vpop.f32.mrf.mxu2  ;;  %v4263_v33 = vld [vmem:[#allocation5 + $0x1d0] sm:$0xf0] }
  0xfc   :  { %2608 = vmatpush.bf16.msrb.mxu1 %v4230_v41  ;;  %v1596_v15 = vpop.f32.mrf.mxu3  ;;  %v4138_v41 = vor.u32 %v4923_v30, %v4135_v31  ;;  %v4266_v39 = vor.u32 %v4955_v32, %v4263_v33  ;;  %v4391_v30 = vld [vmem:[#allocation5 + $0x2d0] sm:$0xf0]  ;;  %v4935_v31 = vld [vmem:[#allocation5 + $0x124] sm:$0xf] }
  0xfd   :  { %v4199_v15 = vld [vmem:[#allocation5 + $0x150] sm:$0xf0]  ;;  %v4899_v33 = vld [vmem:[#allocation5 + $0x4] sm:$0xf] }
  0xfe   :  { %2621 = vmatpush.bf16.msrb.mxu2 %v4358_v20  ;;  %v4183_v20 = vld [vmem:[#allocation5 + $0x130] sm:$0xf0] }
  0xff   :  { %2596 = vmatpush.bf16.msrb.mxu0 %v4086_v58  ;;  %v4119_v58 = vld [vmem:[#allocation5 + $0xb0] sm:$0xf0] }
 0x100   :  { %2609 = vmatpush.bf16.msrb.mxu1 %v4214_v46  ;;  %v4247_v46 = vld [vmem:[#allocation5 + $0x1b0] sm:$0xf0]  ;;  %v4122_v47 = vor.u32 %v4919_v42, %v4119_v58  ;;  %v4533_v42 = vld [vmem:[#allocation5 + $0x3e0] sm:$0xf]  ;;  %v5025_v58 = vld [vmem:[#allocation5 + $0x3ec] sm:$0xf0] }
 0x101   :  { %v4250_v50 = vor.u32 %v4951_v45, %v4247_v46  ;;  %v4157_v45 = vld [vmem:[#allocation5 + $0xe8] sm:$0xf]  ;;  %v4930_v46 = vld [vmem:[#allocation5 + $0xf4] sm:$0xf0]  ;;  %v4534_v37 = vor.u32 %v5025_v58, %v4533_v42 }
 0x102   :  { %2622 = vmatpush.bf16.msrb.mxu2 %v4342_v44  ;;  %v4983_v44 = vld [vmem:[#allocation5 + $0x2a4] sm:$0xf]  ;;  %v4221_v42 = vld [vmem:[#allocation5 + $0x168] sm:$0xf]  ;;  %v4946_v58 = vld [vmem:[#allocation5 + $0x174] sm:$0xf0] }
 0x103   :  { %2597 = vmatpush.bf16.msrb.mxu0 %v4070_v55  ;;  %v4947_v55 = vld [vmem:[#allocation5 + $0x184] sm:$0xf]  ;;  %2631 = vmatpush.bf16.msrb.mxu3 %v4534_v37 }
 0x104   :  { %2610 = vmatpush.bf16.msrb.mxu1 %v4198_v22  ;;  %v4106_v22 = vor.u32 %v4915_v51, %v4103_v53  ;;  %v4234_v18 = vor.u32 %v4947_v55, %v4231_v56  ;;  %v4170_v55 = vor.u32 %v4931_v36, %v4167_v38  ;;  %v4158_v56 = vor.u32 %v4930_v46, %v4157_v45  ;;  %v4967_v38 = vld [vmem:[#allocation5 + $0x224] sm:$0xf] }
 0x106   :  { %2623 = vmatpush.bf16.msrb.mxu2 %v4326_v54 }
 0x107   :  { %2598 = vmatpush.bf16.msrb.mxu0 %v4054_v4  ;;  %v4215_v4 = vld [vmem:[#allocation5 + $0x170] sm:$0xf0] }
 0x108   :  { %2611 = vmatpush.bf16.msrb.mxu1 %v4182_v62  ;;  %v4293_v62 = vld [vmem:[#allocation5 + $0x200] sm:$0xf]  ;;  %v4218_v10 = vor.u32 %v4943_v3, %v4215_v4  ;;  %v4125_v4 = vld [vmem:[#allocation5 + $0xa8] sm:$0xf] }
 0x109   :  { %v4294_v11 = vor.u32 %v4965_v8, %v4293_v62  ;;  %v4975_v8 = vld [vmem:[#allocation5 + $0x264] sm:$0xf]  ;;  %v4126_v13 = vor.u32 %v4922_v7, %v4125_v4  ;;  %v4938_v4 = vld [vmem:[#allocation5 + $0x134] sm:$0xf0] }
 0x10a   :  { %2624 = vmatpush.bf16.msrb.mxu2 %v4310_v2 }
 0x10b   :  { %2599 = vmatpush.bf16.msrb.mxu0 %v4038_v24  ;;  %v1607_v61 = vpop.f32.mrf.mxu0  ;;  %v4903_v24 = vld [vmem:[#allocation5 + $0x24] sm:$0xf] }
 0x10c   :  { %2612 = vmatpush.bf16.msrb.mxu1 %v4166_v16  ;;  %v1608_v60 = vadd.f32 %v1607_v61, %v1595_v57  ;;  %v1620_v19 = vpop.f32.mrf.mxu1  ;;  %v4058_v40 = vor.u32 %v4903_v24, %v4055_v26  ;;  %v4141_v57 = vld [vmem:[#allocation5 + $0xc8] sm:$0xf]  ;;  %v4517_v61 = vld [vmem:[#allocation5 + $0x3c0] sm:$0xf]  ;;  %v4327_v26 = vld [vmem:[#allocation5 + $0x250] sm:$0xf0] }
 0x10d   :  { %v4142_v3 = vor.u32 %v4926_v48, %v4141_v57  ;;  %v4109_v24 = vld [vmem:[#allocation5 + $0x88] sm:$0xf] }
 0x10e   :  { %2600 = vmatmul.bf16.vlgmr.msrb.gmra.mxu0 %v5287_v35  ;;  %v1621_v5 = vadd.f32 %v1620_v19, %v1608_v60  ;;  %2625 = vmatpush.bf16.msrb.mxu2 %v4294_v11  ;;  %v4359_v19 = vld [vmem:[#allocation5 + $0x290] sm:$0xf0]  ;;  %v4954_v11 = vld [vmem:[#allocation5 + $0x1b4] sm:$0xf0]  ;;  %v4205_v57 = vld [vmem:[#allocation5 + $0x148] sm:$0xf] }
 0x10f   :  { %2644 = vmatpush.bf16.msra.mxu0 %v4154_v25  ;;  %v4202_v25 = vor.u32 %v4939_v14, %v4199_v15  ;;  %v4485_v14 = vld [vmem:[#allocation5 + $0x380] sm:$0xf]  ;;  %v5013_v15 = vld [vmem:[#allocation5 + $0x38c] sm:$0xf0] }
 0x110   :  { %2657 = vmatpush.bf16.msra.mxu1 %v4282_v43  ;;  %v1807_v9 = vmax.f32 %v1621_v5, 0.0  ;;  %v4987_v43 = vld [vmem:[#allocation5 + $0x2c4] sm:$0xf]  ;;  %v4501_v5 = vld [vmem:[#allocation5 + $0x3a0] sm:$0xf] }
 0x111   :  { %v4394_v32 = vor.u32 %v4987_v43, %v4391_v30  ;;  %v4502_v62 = vor.u32 %v5017_v6, %v4501_v5  ;;  %v4950_v43 = vld [vmem:[#allocation5 + $0x194] sm:$0xf0] }
 0x112   :  { %v5292_v21 = vpack.c.bf16 %v1807_v9, %v1807_v9  ;;  %2670 = vmatpush.bf16.msra.mxu2 %v4410_v17  ;;  %v4343_v9 = vld [vmem:[#allocation5 + $0x270] sm:$0xf0]  ;;  %v4971_v17 = vld [vmem:[#allocation5 + $0x244] sm:$0xf] }
 0x113   :  { %2645 = vmatpush.bf16.msra.mxu0 %v4138_v41  ;;  %v5294_v27 = vpop.f32.mrf.mxu2  ;;  %v1609_v16 = vpop.f32.mrf.mxu0  ;;  %v4039_v41 = vld [vmem:[#allocation5 + $0x10] sm:$0xf0]  ;;  %v4346_v12 = vor.u32 %v4975_v8, %v4343_v9  ;;  %v4330_v30 = vor.u32 %v4971_v17, %v4327_v26  ;;  %v4902_v8 = vld [vmem:[#allocation5 + $0x14] sm:$0xf0]  ;;  %v4421_v9 = vld [vmem:[#allocation5 + $0x300] sm:$0xf] }
 0x114   :  { %2658 = vmatpush.bf16.msra.mxu1 %v4266_v39  ;;  %v5296_v34 = vpop.f32.mrf.mxu3  ;;  %v1622_v29 = vpop.f32.mrf.mxu1  ;;  %v4186_v39 = vor.u32 %v4935_v31, %v4183_v20  ;;  %v4042_v53 = vor.u32 %v4899_v33, %v4039_v41  ;;  %v4918_v16 = vld [vmem:[#allocation5 + $0x94] sm:$0xf0]  ;;  %v4093_v20 = vld [vmem:[#allocation5 + $0x68] sm:$0xf]  ;;  %v5009_v33 = vld [vmem:[#allocation5 + $0x36c] sm:$0xf0] }
 0x115   :  { %2613 = vmatmul.bf16.vlgmr.msrb.gmra.mxu1 %v5292_v21  ;;  %v4237_v29 = vld [vmem:[#allocation5 + $0x188] sm:$0xf]  ;;  %v4110_v31 = vor.u32 %v4918_v16, %v4109_v24  ;;  %v4914_v41 = vld [vmem:[#allocation5 + $0x74] sm:$0xf0]  ;;  %v4159_v24 = vld [vmem:[#allocation5 + $0xf8] sm:$0xf0] }
 0x116   :  { %2671 = vmatpush.bf16.msra.mxu2 %v4394_v32  ;;  %v4469_v32 = vld [vmem:[#allocation5 + $0x360] sm:$0xf]  ;;  %v4094_v37 = vor.u32 %v4914_v41, %v4093_v20  ;;  %v4934_v17 = vld [vmem:[#allocation5 + $0x114] sm:$0xf0]  ;;  %v4287_v26 = vld [vmem:[#allocation5 + $0x1f8] sm:$0xf0] }
 0x117   :  { %2646 = vmatpush.bf16.msra.mxu0 %v4122_v47  ;;  %v4375_v47 = vld [vmem:[#allocation5 + $0x2b0] sm:$0xf0]  ;;  %v4470_v36 = vor.u32 %v5009_v33, %v4469_v32  ;;  %v5019_v32 = vld [vmem:[#allocation5 + $0x3c4] sm:$0xf]  ;;  %v4924_v41 = vld [vmem:[#allocation5 + $0xcc] sm:$0xf] }
 0x118   :  { %2659 = vmatpush.bf16.msra.mxu1 %v4250_v50  ;;  %v4378_v51 = vor.u32 %v4983_v44, %v4375_v47  ;;  %v4077_v47 = vld [vmem:[#allocation5 + $0x48] sm:$0xf]  ;;  %v4519_v33 = vld [vmem:[#allocation5 + $0x3d0] sm:$0xf0] }
 0x11a   :  { %2672 = vmatpush.bf16.msra.mxu2 %v4378_v51  ;;  %v4910_v51 = vld [vmem:[#allocation5 + $0x54] sm:$0xf0] }
 0x11b   :  { %2647 = vmatpush.bf16.msra.mxu0 %v4106_v22  ;;  %v1635_v50 = vpop.f32.mrf.mxu2  ;;  %v5021_v22 = vld [vmem:[#allocation5 + $0x3cc] sm:$0xf0]  ;;  %v4078_v48 = vor.u32 %v4910_v51, %v4077_v47  ;;  %v4952_v51 = vld [vmem:[#allocation5 + $0x1ac] sm:$0xf] }
 0x11c   :  { %2660 = vmatpush.bf16.msra.mxu1 %v4234_v18  ;;  %v1648_v54 = vpop.f32.mrf.mxu3  ;;  %v4518_v60 = vor.u32 %v5021_v22, %v4517_v61  ;;  %v4979_v18 = vld [vmem:[#allocation5 + $0x284] sm:$0xf]  ;;  %v4222_v50 = vor.u32 %v4946_v58, %v4221_v42  ;;  %v4942_v61 = vld [vmem:[#allocation5 + $0x154] sm:$0xf0]  ;;  %v4271_v42 = vld [vmem:[#allocation5 + $0x1d8] sm:$0xf0] }
 0x11d   :  { %v4362_v2 = vor.u32 %v4979_v18, %v4359_v19  ;;  %v4963_v54 = vld [vmem:[#allocation5 + $0x204] sm:$0xf]  ;;  %v4437_v18 = vld [vmem:[#allocation5 + $0x320] sm:$0xf]  ;;  %v4206_v19 = vor.u32 %v4942_v61, %v4205_v57  ;;  %v4916_v61 = vld [vmem:[#allocation5 + $0x8c] sm:$0xf] }
 0x11e   :  { %2632 = vmatpush.bf16.msrb.mxu3 %v4518_v60 }
 0x11f   :  { %2648 = vmatpush.bf16.msra.mxu0 %v4090_v52  ;;  %v4270_v52 = vor.u32 %v4958_v1, %v4269_v0  ;;  %2673 = vmatpush.bf16.msra.mxu2 %v4362_v2  ;;  %v4061_v0 = vld [vmem:[#allocation5 + $0x28] sm:$0xf]  ;;  %v4906_v1 = vld [vmem:[#allocation5 + $0x34] sm:$0xf0]  ;;  %v5001_v2 = vld [vmem:[#allocation5 + $0x32c] sm:$0xf0] }
 0x120   :  { %2661 = vmatpush.bf16.msra.mxu1 %v4218_v10  ;;  %v4253_v10 = vld [vmem:[#allocation5 + $0x1a8] sm:$0xf]  ;;  %v4438_v6 = vor.u32 %v5001_v2, %v4437_v18  ;;  %v4948_v18 = vld [vmem:[#allocation5 + $0x18c] sm:$0xf]  ;;  %v4471_v2 = vld [vmem:[#allocation5 + $0x370] sm:$0xf0] }
 0x122   :  { %2633 = vmatpush.bf16.msrb.mxu3 %v4502_v62  ;;  %v4062_v62 = vor.u32 %v4906_v1, %v4061_v0  ;;  %v5007_v1 = vld [vmem:[#allocation5 + $0x364] sm:$0xf] }
 0x123   :  { %2649 = vmatpush.bf16.msra.mxu0 %v4074_v23  ;;  %v4254_v23 = vor.u32 %v4954_v11, %v4253_v10  ;;  %2674 = vmatpush.bf16.msra.mxu2 %v4346_v12  ;;  %v4997_v10 = vld [vmem:[#allocation5 + $0x30c] sm:$0xf0]  ;;  %v4173_v12 = vld [vmem:[#allocation5 + $0x108] sm:$0xf] }
 0x124   :  { %2662 = vmatpush.bf16.msra.mxu1 %v4202_v25  ;;  %v4486_v25 = vor.u32 %v5013_v15, %v4485_v14  ;;  %v5023_v14 = vld [vmem:[#allocation5 + $0x3e4] sm:$0xf]  ;;  %v4535_v15 = vld [vmem:[#allocation5 + $0x3f0] sm:$0xf0] }
 0x125   :  { %v4538_v16 = vor.u32 %v5023_v14, %v4535_v15  ;;  %v4908_v15 = vld [vmem:[#allocation5 + $0x4c] sm:$0xf] }
 0x126   :  { %2634 = vmatpush.bf16.msrb.mxu3 %v4486_v25  ;;  %v4960_v25 = vld [vmem:[#allocation5 + $0x1ec] sm:$0xf] }
 0x127   :  { %2650 = vmatpush.bf16.msra.mxu0 %v4058_v40  ;;  %v4238_v40 = vor.u32 %v4950_v43, %v4237_v29  ;;  %2675 = vmatpush.bf16.msra.mxu2 %v4330_v30 }
 0x128   :  { %2663 = vmatpush.bf16.msra.mxu1 %v4186_v39  ;;  %v4311_v39 = vld [vmem:[#allocation5 + $0x230] sm:$0xf0] }
 0x129   :  { %v4314_v45 = vor.u32 %v4967_v38, %v4311_v39  ;;  %v4522_v38 = vor.u32 %v5019_v32, %v4519_v33  ;;  %v4956_v39 = vld [vmem:[#allocation5 + $0x1cc] sm:$0xf] }
 0x12a   :  { %2635 = vmatpush.bf16.msrb.mxu3 %v4470_v36  ;;  %v4143_v36 = vld [vmem:[#allocation5 + $0xd8] sm:$0xf0] }
 0x12b   :  { %2651 = vmatpush.bf16.msra.mxu0 %v4042_v53  ;;  %v5301_v44 = vpop.f32.mrf.mxu0  ;;  %2676 = vmatpush.bf16.msra.mxu2 %v4314_v45  ;;  %v4454_v53 = vor.u32 %v5005_v63, %v4453_v49  ;;  %v4146_v58 = vor.u32 %v4924_v41, %v4143_v36  ;;  %v5015_v45 = vld [vmem:[#allocation5 + $0x3a4] sm:$0xf]  ;;  %v4274_v49 = vor.u32 %v4956_v39, %v4271_v42  ;;  %v4920_v63 = vld [vmem:[#allocation5 + $0xac] sm:$0xf] }
 0x12c   :  { %2664 = vmatpush.bf16.msra.mxu1 %v4170_v55  ;;  %v5303_v46 = vpop.f32.mrf.mxu1  ;;  %v4295_v55 = vld [vmem:[#allocation5 + $0x210] sm:$0xf0]  ;;  %v4936_v36 = vld [vmem:[#allocation5 + $0x12c] sm:$0xf] }
 0x12d   :  { %v4298_v22 = vor.u32 %v4963_v54, %v4295_v55  ;;  %v5011_v54 = vld [vmem:[#allocation5 + $0x384] sm:$0xf]  ;;  %v4487_v55 = vld [vmem:[#allocation5 + $0x390] sm:$0xf0] }
 0x12e   :  { %2652 = vmatmul.bf16.vlgmr.msra.gmra.mxu0 %v5287_v35  ;;  %2636 = vmatpush.bf16.msrb.mxu3 %v4454_v53  ;;  %v4255_v53 = vld [vmem:[#allocation5 + $0x1b8] sm:$0xf0] }
 0x12f   :  { %2696 = vmatpush.bf16.msrb.mxu0 %v4158_v56  ;;  %2665 = vmatmul.bf16.vlgmr.msra.gmra.mxu1 %v5292_v21  ;;  %v291_v56 = vperm.slane %v5264_v28, 2  ;;  %v4189_v28 = vld [vmem:[#allocation5 + $0x128] sm:$0xf] }
 0x130   :  { %2709 = vmatpush.bf16.msrb.mxu1 %v4286_v59  ;;  %2677 = vmatpush.bf16.msra.mxu2 %v4298_v22  ;;  %v4190_v11 = vor.u32 %v4938_v4, %v4189_v28  ;;  %v4111_v22 = vld [vmem:[#allocation5 + $0x98] sm:$0xf0]  ;;  %v4912_v4 = vld [vmem:[#allocation5 + $0x6c] sm:$0xf] }
 0x131   :  { %v4114_v0 = vor.u32 %v4916_v61, %v4111_v22 }
 0x132   :  { %2637 = vmatpush.bf16.msrb.mxu3 %v4438_v6 }
 0x133   :  { %2697 = vmatpush.bf16.msrb.mxu0 %v4142_v3  ;;  %v5306_v59 = vpop.f32.mrf.mxu2  ;;  %v1634_v3 = vadd.f32 %v5294_v27, %v291_v56  ;;  %v1661_v5 = vpop.f32.mrf.mxu0 }
 0x134   :  { %2710 = vmatpush.bf16.msrb.mxu1 %v4270_v52  ;;  %v5308_v60 = vpop.f32.mrf.mxu3  ;;  %v4045_v52 = vld [vmem:[#allocation5 + $0x8] sm:$0xf]  ;;  %v1674_v7 = vpop.f32.mrf.mxu1  ;;  %v4095_v5 = vld [vmem:[#allocation5 + $0x78] sm:$0xf0] }
 0x135   :  { %v1647_v27 = vadd.f32 %v5296_v34, %v1634_v3  ;;  %v4046_v43 = vor.u32 %v4902_v8, %v4045_v52  ;;  %v4290_v34 = vor.u32 %v4960_v25, %v4287_v26  ;;  %v4944_v52 = vld [vmem:[#allocation5 + $0x16c] sm:$0xf]  ;;  %v4223_v7 = vld [vmem:[#allocation5 + $0x178] sm:$0xf0]  ;;  %v4413_v8 = vld [vmem:[#allocation5 + $0x2e8] sm:$0xf] }
 0x136   :  { %v4397_v26 = vld [vmem:[#allocation5 + $0x2c8] sm:$0xf] }
 0x137   :  { %2698 = vmatpush.bf16.msrb.mxu0 %v4126_v13  ;;  %v4422_v13 = vor.u32 %v4997_v10, %v4421_v9  ;;  %v4994_v9 = vld [vmem:[#allocation5 + $0x2f4] sm:$0xf0]  ;;  %v4098_v10 = vor.u32 %v4912_v4, %v4095_v5  ;;  %v4333_v5 = vld [vmem:[#allocation5 + $0x248] sm:$0xf] }
 0x138   :  { %2711 = vmatpush.bf16.msrb.mxu1 %v4254_v23  ;;  %v4928_v23 = vld [vmem:[#allocation5 + $0xec] sm:$0xf] }
 0x139   :  { %2638 = vmatpush.bf16.msrb.mxu3 %v4422_v13  ;;  %v4162_v20 = vor.u32 %v4928_v23, %v4159_v24  ;;  %v4455_v13 = vld [vmem:[#allocation5 + $0x350] sm:$0xf0]  ;;  %v4940_v23 = vld [vmem:[#allocation5 + $0x14c] sm:$0xf]  ;;  %v4207_v24 = vld [vmem:[#allocation5 + $0x158] sm:$0xf0] }
 0x13b   :  { %2699 = vmatpush.bf16.msrb.mxu0 %v4110_v31  ;;  %v1687_v29 = vpop.f32.mrf.mxu2  ;;  %v4174_v31 = vor.u32 %v4934_v17, %v4173_v12  ;;  %v5003_v12 = vld [vmem:[#allocation5 + $0x344] sm:$0xf]  ;;  %v4414_v17 = vor.u32 %v4994_v9, %v4413_v8 }
 0x13c   :  { %2712 = vmatpush.bf16.msrb.mxu1 %v4238_v40  ;;  %v1700_v30 = vpop.f32.mrf.mxu3  ;;  %v1660_v40 = vadd.f32 %v5301_v44, %v1647_v27  ;;  %v4079_v27 = vld [vmem:[#allocation5 + $0x58] sm:$0xf0]  ;;  %v4990_v29 = vld [vmem:[#allocation5 + $0x2d4] sm:$0xf0] }
 0x13d   :  { %2683 = vmatpush.bf16.msra.mxu3 %v4538_v16  ;;  %v4458_v16 = vor.u32 %v5003_v12, %v4455_v13  ;;  %v4999_v30 = vld [vmem:[#allocation5 + $0x324] sm:$0xf]  ;;  %v4398_v41 = vor.u32 %v4990_v29, %v4397_v26  ;;  %v4301_v12 = vld [vmem:[#allocation5 + $0x208] sm:$0xf]  ;;  %v4966_v13 = vld [vmem:[#allocation5 + $0x214] sm:$0xf0] }
 0x13e   :  { %v1673_v47 = vadd.f32 %v5303_v46, %v1660_v40  ;;  %v4258_v46 = vor.u32 %v4952_v51, %v4255_v53  ;;  %v4904_v40 = vld [vmem:[#allocation5 + $0x2c] sm:$0xf] }
 0x13f   :  { %2700 = vmatpush.bf16.msrb.mxu0 %v4094_v37  ;;  %v4503_v37 = vld [vmem:[#allocation5 + $0x3b0] sm:$0xf0]  ;;  %v4900_v51 = vld [vmem:[#allocation5 + $0xc] sm:$0xf] }
 0x140   :  { %2713 = vmatpush.bf16.msrb.mxu1 %v4222_v50  ;;  %v4127_v50 = vld [vmem:[#allocation5 + $0xb8] sm:$0xf0]  ;;  %v4506_v44 = vor.u32 %v5015_v45, %v4503_v37  ;;  %v1686_v57 = vadd.f32 %v5306_v59, %v1673_v47  ;;  %v4474_v59 = vor.u32 %v5007_v1, %v4471_v2  ;;  %v4986_v45 = vld [vmem:[#allocation5 + $0x2b4] sm:$0xf0]  ;;  %v4349_v2 = vld [vmem:[#allocation5 + $0x268] sm:$0xf] }
 0x141   :  { %2684 = vmatpush.bf16.msra.mxu3 %v4522_v38  ;;  %v4130_v56 = vor.u32 %v4920_v63, %v4127_v50  ;;  %v4191_v38 = vld [vmem:[#allocation5 + $0x138] sm:$0xf0]  ;;  %v4423_v63 = vld [vmem:[#allocation5 + $0x310] sm:$0xf0] }
 0x142   :  { %v1699_v3 = vadd.f32 %v5308_v60, %v1686_v57  ;;  %v4226_v60 = vor.u32 %v4944_v52, %v4223_v7  ;;  %v4194_v50 = vor.u32 %v4936_v36, %v4191_v38  ;;  %v4365_v57 = vld [vmem:[#allocation5 + $0x288] sm:$0xf]  ;;  %v4980_v38 = vld [vmem:[#allocation5 + $0x28c] sm:$0xf] }
 0x143   :  { %2701 = vmatpush.bf16.msrb.mxu0 %v4078_v48  ;;  %v4490_v48 = vor.u32 %v5011_v54, %v4487_v55  ;;  %v4932_v54 = vld [vmem:[#allocation5 + $0x10c] sm:$0xf]  ;;  %v4175_v55 = vld [vmem:[#allocation5 + $0x118] sm:$0xf0]  ;;  %v4317_v7 = vld [vmem:[#allocation5 + $0x228] sm:$0xf] }
 0x144   :  { %2714 = vmatpush.bf16.msrb.mxu1 %v4206_v19  ;;  %v4239_v19 = vld [vmem:[#allocation5 + $0x198] sm:$0xf0]  ;;  %v4178_v22 = vor.u32 %v4932_v54, %v4175_v55 }
 0x145   :  { %2685 = vmatpush.bf16.msra.mxu3 %v4506_v44  ;;  %v4242_v28 = vor.u32 %v4948_v18, %v4239_v19  ;;  %v4047_v44 = vld [vmem:[#allocation5 + $0x18] sm:$0xf0] }
 0x146   :  { %v4050_v61 = vor.u32 %v4900_v51, %v4047_v44  ;;  %v4351_v51 = vld [vmem:[#allocation5 + $0x278] sm:$0xf0]  ;;  %v4509_v44 = vld [vmem:[#allocation5 + $0x3a8] sm:$0xf] }
 0x147   :  { %2702 = vmatpush.bf16.msrb.mxu0 %v4062_v62 }
 0x148   :  { %2715 = vmatpush.bf16.msrb.mxu1 %v4190_v11 }
 0x149   :  { %2686 = vmatpush.bf16.msra.mxu3 %v4490_v48 }
 0x14b   :  { %2703 = vmatpush.bf16.msrb.mxu0 %v4046_v43  ;;  %v1711_v6 = vpop.f32.mrf.mxu0  ;;  %v4082_v43 = vor.u32 %v4908_v15, %v4079_v27  ;;  %v4302_v15 = vor.u32 %v4966_v13, %v4301_v12  ;;  %v4988_v27 = vld [vmem:[#allocation5 + $0x2cc] sm:$0xf]  ;;  %v4429_v13 = vld [vmem:[#allocation5 + $0x308] sm:$0xf] }
 0x14c   :  { %2716 = vmatpush.bf16.msrb.mxu1 %v4174_v31  ;;  %v1712_v62 = vadd.f32 %v1711_v6, %v1699_v3  ;;  %v5318_v11 = vpop.f32.mrf.mxu1  ;;  %v4439_v31 = vld [vmem:[#allocation5 + $0x330] sm:$0xf0]  ;;  %v4978_v3 = vld [vmem:[#allocation5 + $0x274] sm:$0xf0] }
 0x14d   :  { %2687 = vmatpush.bf16.msra.mxu3 %v4474_v59  ;;  %v4442_v42 = vor.u32 %v4999_v30, %v4439_v31  ;;  %v4974_v59 = vld [vmem:[#allocation5 + $0x254] sm:$0xf0]  ;;  %v4984_v31 = vld [vmem:[#allocation5 + $0x2ac] sm:$0xf] }
 0x14e   :  { %2704 = vmatmul.bf16.vlgmr.msrb.gmra.mxu0 %v5287_v35  ;;  %v1808_v14 = vmax.f32 %v1712_v62, 0.0  ;;  %v4334_v6 = vor.u32 %v4974_v59, %v4333_v5  ;;  %v4970_v62 = vld [vmem:[#allocation5 + $0x234] sm:$0xf0]  ;;  %v4461_v59 = vld [vmem:[#allocation5 + $0x348] sm:$0xf] }
 0x14f   :  { %2748 = vmatpush.bf16.msra.mxu0 %v4162_v20  ;;  %2717 = vmatmul.bf16.vlgmr.msrb.gmra.mxu1 %v5292_v21  ;;  %v4210_v20 = vor.u32 %v4940_v23, %v4207_v24  ;;  %v4318_v8 = vor.u32 %v4970_v62, %v4317_v7  ;;  %v4445_v62 = vld [vmem:[#allocation5 + $0x328] sm:$0xf] }
 0x150   :  { %2761 = vmatpush.bf16.msra.mxu1 %v4290_v34  ;;  %v5320_v25 = vpack.c.bf16 %v1808_v14, %v1808_v14  ;;  %v4063_v34 = vld [vmem:[#allocation5 + $0x38] sm:$0xf0]  ;;  %v4992_v14 = vld [vmem:[#allocation5 + $0x2ec] sm:$0xf] }
 0x151   :  { %2688 = vmatpush.bf16.msra.mxu3 %v4458_v16  ;;  %v4066_v37 = vor.u32 %v4904_v40, %v4063_v34  ;;  %v5026_v40 = vld [vmem:[#allocation5 + $0x3f4] sm:$0xf0] }
 0x152   :  { %2626 = vmatmul.bf16.vlgmr.msrb.gmra.mxu2 %v5320_v25 }
 0x153   :  { %2749 = vmatpush.bf16.msra.mxu0 %v4146_v58  ;;  %v1737_v32 = vpop.f32.mrf.mxu2  ;;  %2722 = vmatpush.bf16.msrb.mxu2 %v4414_v17  ;;  %v1713_v39 = vpop.f32.mrf.mxu0  ;;  %v4381_v58 = vld [vmem:[#allocation5 + $0x2a8] sm:$0xf]  ;;  %v4399_v17 = vld [vmem:[#allocation5 + $0x2d8] sm:$0xf0] }
 0x154   :  { %2762 = vmatpush.bf16.msra.mxu1 %v4274_v49  ;;  %v1750_v33 = vpop.f32.mrf.mxu3  ;;  %v1726_v47 = vpop.f32.mrf.mxu1  ;;  %v4995_v49 = vld [vmem:[#allocation5 + $0x304] sm:$0xf]  ;;  %v4382_v53 = vor.u32 %v4986_v45, %v4381_v58  ;;  %v4367_v39 = vld [vmem:[#allocation5 + $0x298] sm:$0xf0]  ;;  %v4525_v58 = vld [vmem:[#allocation5 + $0x3c8] sm:$0xf] }
 0x155   :  { %2689 = vmatpush.bf16.msra.mxu3 %v4442_v42  ;;  %v5022_v45 = vld [vmem:[#allocation5 + $0x3d4] sm:$0xf0] }
 0x157   :  { %2750 = vmatpush.bf16.msra.mxu0 %v4130_v56  ;;  %2723 = vmatpush.bf16.msrb.mxu2 %v4398_v41  ;;  %v4426_v56 = vor.u32 %v4995_v49, %v4423_v63  ;;  %v4370_v49 = vor.u32 %v4980_v38, %v4367_v39  ;;  %v4526_v63 = vor.u32 %v5022_v45, %v4525_v58  ;;  %v5004_v38 = vld [vmem:[#allocation5 + $0x34c] sm:$0xf]  ;;  %v4463_v39 = vld [vmem:[#allocation5 + $0x358] sm:$0xf0] }
 0x158   :  { %2763 = vmatpush.bf16.msra.mxu1 %v4258_v46  ;;  %v4982_v46 = vld [vmem:[#allocation5 + $0x294] sm:$0xf0]  ;;  %v4466_v45 = vor.u32 %v5004_v38, %v4463_v39 }
 0x159   :  { %v4366_v19 = vor.u32 %v4982_v46, %v4365_v57  ;;  %2690 = vmatpush.bf16.msra.mxu3 %v4426_v56  ;;  %v4972_v56 = vld [vmem:[#allocation5 + $0x24c] sm:$0xf]  ;;  %v4335_v57 = vld [vmem:[#allocation5 + $0x258] sm:$0xf0]  ;;  %v4493_v46 = vld [vmem:[#allocation5 + $0x388] sm:$0xf] }
 0x15b   :  { %2751 = vmatpush.bf16.msra.mxu0 %v4114_v0  ;;  %v1739_v48 = vpop.f32.mrf.mxu2  ;;  %2724 = vmatpush.bf16.msrb.mxu2 %v4382_v53  ;;  %v5065_v0 = vld [vmem:[%s5463_s2] sm:$0xf]  ;;  %v5018_v53 = vld [vmem:[#allocation5 + $0x3b4] sm:$0xf0] }
 0x15c   :  { %2764 = vmatpush.bf16.msra.mxu1 %v4242_v28  ;;  %v1752_v18 = vpop.f32.mrf.mxu3  ;;  %v292_v1 = vperm.slane %v5065_v0, 3  ;;  %v4350_v28 = vor.u32 %v4978_v3, %v4349_v2  ;;  %v4510_v55 = vor.u32 %v5018_v53, %v4509_v44  ;;  %v4477_v0 = vld [vmem:[#allocation5 + $0x368] sm:$0xf]  ;;  %v4996_v44 = vld [vmem:[#allocation5 + $0x30c] sm:$0xf] }
 0x15d   :  { %v4968_v18 = vld [vmem:[#allocation5 + $0x22c] sm:$0xf]  ;;  %v4431_v53 = vld [vmem:[#allocation5 + $0x318] sm:$0xf0] }
 0x15e   :  { %v1725_v4 = vadd.f32 %v5318_v11, %v292_v1  ;;  %v5010_v1 = vld [vmem:[#allocation5 + $0x374] sm:$0xf0] }
 0x15f   :  { %2752 = vmatpush.bf16.msra.mxu0 %v4098_v10  ;;  %2725 = vmatpush.bf16.msrb.mxu2 %v4366_v19  ;;  %v4319_v19 = vld [vmem:[#allocation5 + $0x238] sm:$0xf0]  ;;  %v4478_v3 = vor.u32 %v5010_v1, %v4477_v0  ;;  %v5031_v1 = vld [vmem:[%s5466_s5 + $0x20] sm:$0xff] }
 0x160   :  { %2765 = vmatpush.bf16.msra.mxu1 %v4226_v60  ;;  %v1738_v52 = vadd.f32 %v1737_v32, %v1725_v4  ;;  %v4322_v2 = vor.u32 %v4968_v18, %v4319_v19  ;;  %v4303_v4 = vld [vmem:[#allocation5 + $0x218] sm:$0xf0]  ;;  %v5033_v18 = vld [vmem:[%s5466_s5 + $0x30] sm:$0xff] }
 0x162   :  { %2678 = vmatmul.bf16.vlgmr.msra.gmra.mxu2 %v5320_v25  ;;  %v1751_v9 = vadd.f32 %v1750_v33, %v1738_v52  ;;  %v4541_v33 = vld [vmem:[#allocation5 + $0x3e8] sm:$0xf] }
 0x163   :  { %2753 = vmatpush.bf16.msra.mxu0 %v4082_v43  ;;  %2726 = vmatpush.bf16.msrb.mxu2 %v4350_v28  ;;  %v4402_v43 = vor.u32 %v4988_v27, %v4399_v17  ;;  %v4542_v36 = vor.u32 %v5026_v40, %v4541_v33  ;;  %v4964_v28 = vld [vmem:[#allocation5 + $0x20c] sm:$0xf]  ;;  %v4527_v17 = vld [vmem:[#allocation5 + $0x3d8] sm:$0xf0] }
 0x164   :  { %2766 = vmatpush.bf16.msra.mxu1 %v4210_v20  ;;  %v4383_v20 = vld [vmem:[#allocation5 + $0x2b8] sm:$0xf0]  ;;  %v4306_v52 = vor.u32 %v4964_v28, %v4303_v4  ;;  %v5020_v27 = vld [vmem:[#allocation5 + $0x3cc] sm:$0xf]  ;;  %v5029_v4 = vld [vmem:[%s5466_s5 + $0x10] sm:$0xff] }
 0x165   :  { %v4386_v41 = vor.u32 %v4984_v31, %v4383_v20  ;;  %v4495_v31 = vld [vmem:[#allocation5 + $0x398] sm:$0xf0]  ;;  %v5008_v33 = vld [vmem:[#allocation5 + $0x36c] sm:$0xf] }
 0x166   :  { %v4479_v40 = vld [vmem:[#allocation5 + $0x378] sm:$0xf0] }
 0x167   :  { %2754 = vmatpush.bf16.msra.mxu0 %v4066_v37  ;;  %2727 = vmatpush.bf16.msrb.mxu2 %v4334_v6  ;;  %v5006_v6 = vld [vmem:[#allocation5 + $0x354] sm:$0xf0] }
 0x168   :  { %2767 = vmatpush.bf16.msra.mxu1 %v4194_v50  ;;  %v4976_v50 = vld [vmem:[#allocation5 + $0x26c] sm:$0xf]  ;;  %v4462_v7 = vor.u32 %v5006_v6, %v4461_v59 }
 0x169   :  { %v4354_v54 = vor.u32 %v4976_v50, %v4351_v51  ;;  %v5028_v6 = vld [vmem:[%s5466_s5 + $0x8] sm:$0xff] }
 0x16b   :  { %2755 = vmatpush.bf16.msra.mxu0 %v4050_v61  ;;  %v1763_v10 = vpop.f32.mrf.mxu0  ;;  %2728 = vmatpush.bf16.msrb.mxu2 %v4318_v8  ;;  %v5014_v61 = vld [vmem:[#allocation5 + $0x394] sm:$0xf0] }
 0x16c   :  { %2768 = vmatpush.bf16.msra.mxu1 %v4178_v22  ;;  %v1776_v11 = vpop.f32.mrf.mxu1  ;;  %v1764_v60 = vadd.f32 %v1763_v10, %v1751_v9  ;;  %v4338_v22 = vor.u32 %v4972_v56, %v4335_v57  ;;  %v4494_v48 = vor.u32 %v5014_v61, %v4493_v46  ;;  %v5002_v8 = vld [vmem:[#allocation5 + $0x334] sm:$0xf0]  ;;  %v5338_v10 = vld [vmem:[%s5465_s4] sm:$0xf] }
 0x16d   :  { %v4446_v9 = vor.u32 %v5002_v8, %v4445_v62  ;;  %v1946_v56 = vperm.slane %v5338_v10, 2  ;;  %v5034_v46 = vld [vmem:[%s5466_s5 + $0x38] sm:$0xff]  ;;  %v1947_v59 = vperm.slane %v5338_v10, 3 }
 0x16e   :  { %2756 = vmatmul.bf16.vlgmr.msra.gmra.mxu0 %v5287_v35  ;;  %v4415_v35 = vld [vmem:[#allocation5 + $0x2f8] sm:$0xf0]  ;;  %v1777_v23 = vadd.f32 %v1776_v11, %v1764_v60  ;;  %v4998_v11 = vld [vmem:[#allocation5 + $0x314] sm:$0xf0]  ;;  %v1944_v60 = vperm.slane %v5338_v10, 0 }
 0x16f   :  { %2769 = vmatmul.bf16.vlgmr.msra.gmra.mxu1 %v5292_v21  ;;  %v4418_v21 = vor.u32 %v4992_v14, %v4415_v35  ;;  %2729 = vmatpush.bf16.msrb.mxu2 %v4302_v15  ;;  %v5024_v14 = vld [vmem:[#allocation5 + $0x3ec] sm:$0xf]  ;;  %v4543_v35 = vld [vmem:[#allocation5 + $0x3f8] sm:$0xf0]  ;;  %v4430_v15 = vor.u32 %v4998_v11, %v4429_v13 }
 0x170   :  { %3068 = vmatpush.bf16.msrb.mxu0 %v5034_v46  ;;  %v5038_v11 = vld [vmem:[%s5466_s5 + $0x58] sm:$0xff]  ;;  %v5051_v46 = vld [vmem:[%s5466_s5 + $0xc0] sm:$0xff] }
 0x172   :  { %2730 = vmatmul.bf16.vlgmr.msrb.gmra.mxu2 %v5320_v25 }
 0x173   :  { %v1789_v24 = vpop.f32.mrf.mxu2  ;;  %2774 = vmatpush.bf16.msra.mxu2 %v4418_v21  ;;  %v1765_v29 = vpop.f32.mrf.mxu0  ;;  %v4546_v21 = vor.u32 %v5024_v14, %v4543_v35  ;;  %v5050_v14 = vld [vmem:[%s5466_s5 + $0xb8] sm:$0xff]  ;;  %v5037_v35 = vld [vmem:[%s5466_s5 + $0x50] sm:$0xff] }
 0x174   :  { %v1790_v16 = vadd.f32 %v1789_v24, %v1777_v23  ;;  %v1802_v26 = vpop.f32.mrf.mxu3  ;;  %v1778_v30 = vpop.f32.mrf.mxu1  ;;  %v5016_v29 = vld [vmem:[#allocation5 + $0x3ac] sm:$0xf]  ;;  %3069 = vmatpush.bf16.msrb.mxu0 %v5033_v18 }
 0x175   :  { %v5012_v30 = vld [vmem:[#allocation5 + $0x38c] sm:$0xf] }
 0x176   :  { %v1803_v32 = vadd.f32 %v1802_v26, %v1790_v16  ;;  %v4530_v16 = vor.u32 %v5020_v27, %v4527_v17  ;;  %v5036_v17 = vld [vmem:[%s5466_s5 + $0x48] sm:$0xff] }
 0x177   :  { %2775 = vmatpush.bf16.msra.mxu2 %v4402_v43  ;;  %v4511_v43 = vld [vmem:[#allocation5 + $0x3b8] sm:$0xf0] }
 0x178   :  { %v1809_v34 = vmax.f32 %v1803_v32, 0.0  ;;  %v4498_v32 = vor.u32 %v5012_v30, %v4495_v31 }
 0x17a   :  { %v5331_v42 = vpack.c.bf16 %v1809_v34, %v1809_v34  ;;  %v1945_v34 = vperm.slane %v5338_v10, 1  ;;  %v5039_v10 = vld [vmem:[%s5466_s5 + $0x60] sm:$0xff] }
 0x17b   :  { %v1791_v37 = vpop.f32.mrf.mxu2  ;;  %2776 = vmatpush.bf16.msra.mxu2 %v4386_v41  ;;  %v4482_v41 = vor.u32 %v5008_v33, %v4479_v40 }
 0x17c   :  { %v1804_v47 = vpop.f32.mrf.mxu3  ;;  %2639 = vmatmul.bf16.vlgmr.msrb.gmra.mxu3 %v5331_v42 }
 0x17d   :  { %2735 = vmatpush.bf16.msrb.mxu3 %v4542_v36  ;;  %v5000_v47 = vld [vmem:[#allocation5 + $0x32c] sm:$0xf] }
 0x17f   :  { %2777 = vmatpush.bf16.msra.mxu2 %v4370_v49  ;;  %v4447_v49 = vld [vmem:[#allocation5 + $0x338] sm:$0xf0] }
 0x180   :  { %v4450_v50 = vor.u32 %v5000_v47, %v4447_v49 }
 0x181   :  { %2736 = vmatpush.bf16.msrb.mxu3 %v4526_v63 }
 0x183   :  { %2778 = vmatpush.bf16.msra.mxu2 %v4354_v54  ;;  %v4434_v54 = vor.u32 %v4996_v44, %v4431_v53  ;;  %v5053_v53 = vld [vmem:[%s5466_s5 + $0xd0] sm:$0xff] }
 0x185   :  { %2737 = vmatpush.bf16.msrb.mxu3 %v4510_v55 }
 0x187   :  { %2779 = vmatpush.bf16.msra.mxu2 %v4338_v22 }
 0x189   :  { %2738 = vmatpush.bf16.msrb.mxu3 %v4494_v48 }
 0x18b   :  { %v2601_v5 = vpop.f32.mrf.mxu0  ;;  %2780 = vmatpush.bf16.msra.mxu2 %v4322_v2  ;;  %v5042_v2 = vld [vmem:[%s5466_s5 + $0x78] sm:$0xff] }
 0x18c   :  { %2691 = vmatmul.bf16.vlgmr.msra.gmra.mxu3 %v5331_v42  ;;  %v2602_v23 = vadd.f32 %v2601_v5, %v1944_v60  ;;  %3081 = vmatpush.bf16.msrb.mxu1 %v5042_v2  ;;  %v5041_v5 = vld [vmem:[%s5466_s5 + $0x70] sm:$0xff] }
 0x18d   :  { %2739 = vmatpush.bf16.msrb.mxu3 %v4478_v3  ;;  %v5030_v3 = vld [vmem:[%s5466_s5 + $0x18] sm:$0xff]  ;;  %v5049_v60 = vld [vmem:[%s5466_s5 + $0xb0] sm:$0xff] }
 0x18f   :  { %2781 = vmatpush.bf16.msra.mxu2 %v4306_v52  ;;  %v5040_v52 = vld [vmem:[%s5466_s5 + $0x68] sm:$0xff] }
 0x190   :  { %3082 = vmatpush.bf16.msrb.mxu1 %v5041_v5 }
 0x191   :  { %2740 = vmatpush.bf16.msrb.mxu3 %v4462_v7 }
 0x192   :  { %2782 = vmatmul.bf16.vlgmr.msra.gmra.mxu2 %v5320_v25  ;;  %v2614_v24 = vpop.f32.mrf.mxu1  ;;  %v4514_v25 = vor.u32 %v5016_v29, %v4511_v43  ;;  %v5047_v29 = vld [vmem:[%s5466_s5 + $0xa0] sm:$0xff]  ;;  %v5046_v43 = vld [vmem:[%s5466_s5 + $0x98] sm:$0xff] }
 0x193   :  { %v2603_v12 = vpop.f32.mrf.mxu0  ;;  %v5342_v26 = vadd.f32 %v2614_v24, %v2602_v23  ;;  %3094 = vmatpush.bf16.msrb.mxu2 %v5050_v14  ;;  %v5048_v23 = vld [vmem:[%s5466_s5 + $0xa8] sm:$0xff] }
 0x194   :  { %3083 = vmatpush.bf16.msrb.mxu1 %v5040_v52  ;;  %v5027_v12 = vld [vmem:[%s5466_s5] sm:$0xff] }
 0x195   :  { %2741 = vmatpush.bf16.msrb.mxu3 %v4446_v9 }
 0x197   :  { %3095 = vmatpush.bf16.msrb.mxu2 %v5049_v60 }
 0x198   :  { %3084 = vmatpush.bf16.msrb.mxu1 %v5039_v10 }
 0x199   :  { %2742 = vmatpush.bf16.msrb.mxu3 %v4430_v15 }
 0x19a   :  { %v2616_v20 = vpop.f32.mrf.mxu1 }
 0x19b   :  { %3096 = vmatpush.bf16.msrb.mxu2 %v5048_v23  ;;  %v5044_v20 = vld [vmem:[%s5466_s5 + $0x88] sm:$0xff] }
 0x19c   :  { %2743 = vmatmul.bf16.vlgmr.msrb.gmra.mxu3 %v5331_v42  ;;  %3085 = vmatpush.bf16.msrb.mxu1 %v5038_v11 }
 0x19d   :  { %2787 = vmatpush.bf16.msra.mxu3 %v4546_v21 }
 0x19f   :  { %3097 = vmatpush.bf16.msrb.mxu2 %v5047_v29 }
 0x1a0   :  { %3086 = vmatpush.bf16.msrb.mxu1 %v5037_v35 }
 0x1a1   :  { %2788 = vmatpush.bf16.msra.mxu3 %v4530_v16  ;;  %v5035_v16 = vld [vmem:[%s5466_s5 + $0x40] sm:$0xff] }
 0x1a3   :  { %3098 = vmatpush.bf16.msrb.mxu2 %v5046_v43 }
 0x1a4   :  { %3087 = vmatpush.bf16.msrb.mxu1 %v5036_v17 }
 0x1a5   :  { %2789 = vmatpush.bf16.msra.mxu3 %v4514_v25  ;;  %v5045_v25 = vld [vmem:[%s5466_s5 + $0x90] sm:$0xff] }
 0x1a7   :  { %3099 = vmatpush.bf16.msrb.mxu2 %v5045_v25 }
 0x1a8   :  { %3088 = vmatpush.bf16.msrb.mxu1 %v5035_v16 }
 0x1a9   :  { %2790 = vmatpush.bf16.msra.mxu3 %v4498_v32 }
 0x1ab   :  { %v2653_v36 = vpop.f32.mrf.mxu0  ;;  %3100 = vmatpush.bf16.msrb.mxu2 %v5044_v20 }
 0x1ac   :  { %v2654_v58 = vadd.f32 %v2653_v36, %v1945_v34  ;;  %v2666_v37 = vpop.f32.mrf.mxu1  ;;  %v5058_v36 = vld [vmem:[%s5466_s5 + $0xf8] sm:$0xff] }
 0x1ad   :  { %2791 = vmatpush.bf16.msra.mxu3 %v4482_v41  ;;  %v5043_v41 = vld [vmem:[%s5466_s5 + $0x80] sm:$0xff] }
 0x1ae   :  { %v5346_v63 = vadd.f32 %v2666_v37, %v2654_v58  ;;  %v5056_v58 = vld [vmem:[%s5466_s5 + $0xe8] sm:$0xff] }
 0x1af   :  { %3101 = vmatpush.bf16.msrb.mxu2 %v5043_v41 }
 0x1b1   :  { %2792 = vmatpush.bf16.msra.mxu3 %v4466_v45  ;;  %v5055_v45 = vld [vmem:[%s5466_s5 + $0xe0] sm:$0xff] }
 0x1b3   :  { %v2655_v51 = vpop.f32.mrf.mxu0 }
 0x1b4   :  { %v2668_v55 = vpop.f32.mrf.mxu1 }
 0x1b5   :  { %2793 = vmatpush.bf16.msra.mxu3 %v4450_v50  ;;  %v5054_v50 = vld [vmem:[%s5466_s5 + $0xd8] sm:$0xff] }
 0x1b9   :  { %2794 = vmatpush.bf16.msra.mxu3 %v4434_v54 }
 0x1bc   :  { %2795 = vmatmul.bf16.vlgmr.msra.gmra.mxu3 %v5331_v42  ;;  %v5032_v42 = vld [vmem:[%s5466_s5 + $0x28] sm:$0xff] }
 0x1bd   :  { %3070 = vmatpush.bf16.msrb.mxu0 %v5032_v42  ;;  %3107 = vmatpush.bf16.msrb.mxu3 %v5058_v36 }
 0x1c1   :  { %3071 = vmatpush.bf16.msrb.mxu0 %v5031_v1 }
 0x1c5   :  { %3072 = vmatpush.bf16.msrb.mxu0 %v5030_v3 }
 0x1c9   :  { %3073 = vmatpush.bf16.msrb.mxu0 %v5029_v4 }
 0x1cb   :  { %v2705_v57 = vpop.f32.mrf.mxu0 }
 0x1cc   :  { %v2706_v61 = vadd.f32 %v2705_v57, %v1946_v56  ;;  %v2718_v22 = vpop.f32.mrf.mxu1 }
 0x1cd   :  { %3074 = vmatpush.bf16.msrb.mxu0 %v5028_v6 }
 0x1ce   :  { %v5353_v48 = vadd.f32 %v2718_v22, %v2706_v61 }
 0x1d1   :  { %3075 = vmatpush.bf16.msrb.mxu0 %v5027_v12 }
 0x1d3   :  { %v2707_v19 = vpop.f32.mrf.mxu0 }
 0x1d4   :  { %v2720_v0 = vpop.f32.mrf.mxu1 }
 0x1d5   :  { %v2627_v28 = vpop.f32.mrf.mxu2 }
 0x1d6   :  { %v2628_v31 = vadd.f32 %v2627_v28, %v5342_v26  ;;  %v5057_v26 = vld [vmem:[%s5466_s5 + $0xf0] sm:$0xff] }
 0x1d7   :  { %3108 = vmatpush.bf16.msrb.mxu3 %v5057_v26 }
 0x1db   :  { %3109 = vmatpush.bf16.msrb.mxu3 %v5056_v58 }
 0x1dd   :  { %v2629_v62 = vpop.f32.mrf.mxu2 }
 0x1de   :  { %v5064_v62 = vld [vmem:[%s5467_s6] ss:$0 sm:$0xff] }
 0x1df   :  { %3110 = vmatpush.bf16.msrb.mxu3 %v5055_v45 }
 0x1e3   :  { %3111 = vmatpush.bf16.msrb.mxu3 %v5054_v50 }
 0x1e5   :  { %v2679_v21 = vpop.f32.mrf.mxu2 }
 0x1e6   :  { %v2680_v37 = vadd.f32 %v2679_v21, %v5346_v63  ;;  %v5052_v63 = vld [vmem:[%s5466_s5 + $0xc8] sm:$0xff] }
 0x1e7   :  { %3112 = vmatpush.bf16.msrb.mxu3 %v5053_v53 }
 0x1eb   :  { %v2757_v7 = vpop.f32.mrf.mxu0  ;;  %3113 = vmatpush.bf16.msrb.mxu3 %v5052_v63 }
 0x1ec   :  { %v2758_v8 = vadd.f32 %v2757_v7, %v1947_v59  ;;  %v2770_v9 = vpop.f32.mrf.mxu1 }
 0x1ed   :  { %v2681_v24 = vpop.f32.mrf.mxu2 }
 0x1ee   :  { %v5389_v13 = vadd.f32 %v2770_v9, %v2758_v8 }
 0x1ef   :  { %3114 = vmatpush.bf16.msrb.mxu3 %v5051_v46 }
 0x1f3   :  { %v2759_v15 = vpop.f32.mrf.mxu0 }
 0x1f4   :  { %v2772_v27 = vpop.f32.mrf.mxu1 }
 0x1f5   :  { %v2731_v30 = vpop.f32.mrf.mxu2 }
 0x1f6   :  { %v2732_v56 = vadd.f32 %v2731_v30, %v5353_v48 }
 0x1fd   :  { %v2733_v40 = vpop.f32.mrf.mxu2 }
 0x1ff   :  { %v2640_v32 = vpop.f32.mrf.mxu3 }
 0x200   :  { %v2641_v33 = vadd.f32 %v2640_v32, %v2628_v31 }
 0x202   :  { %v2800_v34 = vmax.f32 %v2641_v33, 0.0 }
 0x204   :  { %v2804_v38 = vpack.c.bf16 %v2800_v34, %v2800_v34 }
 0x206   :  { %3076 = vmatmul.bf16.vlgmr.msrb.gmra.mxu0 %v2804_v38 }
 0x207   :  { %v2642_v39 = vpop.f32.mrf.mxu3 }
 0x20f   :  { %v2692_v47 = vpop.f32.mrf.mxu3 }
 0x210   :  { %v2693_v49 = vadd.f32 %v2692_v47, %v2680_v37 }
 0x212   :  { %v2801_v51 = vmax.f32 %v2693_v49, 0.0 }
 0x214   :  { %v2805_v44 = vpack.c.bf16 %v2801_v51, %v2801_v51 }
 0x215   :  { %v2783_v54 = vpop.f32.mrf.mxu2 }
 0x216   :  { %3089 = vmatmul.bf16.vlgmr.msrb.gmra.mxu1 %v2805_v44  ;;  %v2784_v0 = vadd.f32 %v2783_v54, %v5389_v13 }
 0x217   :  { %v2694_v55 = vpop.f32.mrf.mxu3 }
 0x21d   :  { %v2785_v57 = vpop.f32.mrf.mxu2 }
 0x21f   :  { %v2744_v61 = vpop.f32.mrf.mxu3 }
 0x220   :  { %v2745_v22 = vadd.f32 %v2744_v61, %v2732_v56 }
 0x222   :  { %v2802_v18 = vmax.f32 %v2745_v22, 0.0 }
 0x224   :  { %v2806_v19 = vpack.c.bf16 %v2802_v18, %v2802_v18 }
 0x226   :  { %3102 = vmatmul.bf16.vlgmr.msrb.gmra.mxu2 %v2806_v19 }
 0x227   :  { %v2746_v42 = vpop.f32.mrf.mxu3 }
 0x23f   :  { %v2796_v1 = vpop.f32.mrf.mxu3 }
 0x240   :  { %v2797_v2 = vadd.f32 %v2796_v1, %v2784_v0 }
 0x242   :  { %v2803_v3 = vmax.f32 %v2797_v2, 0.0 }
 0x244   :  { %v2807_v28 = vpack.c.bf16 %v2803_v3, %v2803_v3 }
 0x246   :  { %3115 = vmatmul.bf16.vlgmr.msrb.gmra.mxu3 %v2807_v28 }
 0x247   :  { %v2798_v48 = vpop.f32.mrf.mxu3 }
 0x283   :  { %v3077_v4 = vpop.f32.mrf.mxu0 }
 0x284   :  { %v3078_v8 = vadd.f32 %v5064_v62, %v3077_v4 }
 0x28b   :  { %v3079_v5 = vpop.f32.mrf.mxu0 }
 0x293   :  { %v3090_v59 = vpop.f32.mrf.mxu1 }
 0x294   :  { %v3091_v9 = vadd.f32 %v3090_v59, %v3078_v8 }
 0x29b   :  { %v3092_v6 = vpop.f32.mrf.mxu1 }
 0x2a9   :  { %v3103_v52 = vpop.f32.mrf.mxu2 }
 0x2aa   :  { %v3104_v12 = vadd.f32 %v3103_v52, %v3091_v9 }
 0x2b1   :  { %v3105_v7 = vpop.f32.mrf.mxu2 }
 0x2c9   :  { %v3116_v10 = vpop.f32.mrf.mxu3 }
 0x2ca   :  { %v3117_v13 = vadd.f32 %v3116_v10, %v3104_v12 }
 0x2cc   :  { %3120 = vst [vmem:[#allocation7] sm:$0xff] %v3117_v13 }
 0x2cd   :  { %3131 = dma.vmem_to_hbm [thread:$0]  %s3127_s9, 128, %s3129_s12, [#allocation4]  }
 0x2d1   :  { %v3118_v11 = vpop.f32.mrf.mxu3 }
 0x2d2   :  { %5142 = dma.done.wait [#allocation4], 128  }
 0x2d3   :  { %5143 = vsyncadd [#allocation4], 4294967168 }
 0x2d4   :  { %3136 = vsyncpa [#allocation3], 1 }
 0x2d5   :  { %3137 = vsyncpa [#allocation6], 1 }
 0x2d6   :  { %3138 = vsyncpa [#allocation4], 1 }

</bundles_post_ra>
